<compile_context>
chip_gen: v5e
topology: v5e:2x2
jax: 0.10.0
libtpu: 0.0.40
codegen_flags: <defaults>
</compile_context>

<pallas_src>
import functools

import jax
import jax.numpy as jnp
from jax.experimental import pallas as pl
from jax.experimental.pallas import tpu as pltpu


# ----------------------------------------------------------------------------
# Fused kernel: GAT + semantic attention + output linear + cosine similarity
# for one batch block (both sides of all Bb pairs at once).
# ----------------------------------------------------------------------------
def siamhan_fused_kernel(h_ref, node_ref, gatw_ref, semw_ref, vec_ref,
                         outw_ref, outb_ref, sim_ref, *, alpha, n_types,
                         n_nodes):
    two, rows, d = h_ref.shape                  # rows = Bb * T * N
    bb = node_ref.shape[1]
    t = n_types
    n = n_nodes
    g = two * bb                                # graphs in this block
    gt = g * t

    # ---- GAT projection; a1/a2 attention columns folded into the weights --
    h_flat = h_ref[...].reshape(two * rows, d)            # leading-merge only
    whx = jnp.dot(h_flat, gatw_ref[...],
                  preferred_element_type=jnp.float32)     # (G*T*N, D+2) on MXU
    whx = whx.reshape(g, t, n, d + 2)                     # lanes preserved

    # ---- analytic static-adjacency attention -------------------------------
    # Only row 0 (centre node) is unmasked: its neighbour scores are
    # LeakyReLU(e1[0] + e2[j]).  Fully masked rows reduce to exactly uniform
    # 1/N attention, i.e. a plain mean over Wh -- no (N,N) score tensor.
    s = whx[:, :, 0:1, d:d + 1] + whx[:, :, :, d + 1:d + 2]   # (G,T,N,1)
    s = jnp.where(s > 0, s, alpha * s)                        # LeakyReLU(0.2)
    s = s - jnp.max(s, axis=2, keepdims=True)
    p = jnp.exp(s)
    att0 = p * pl.reciprocal(jnp.sum(p, axis=2, keepdims=True), approx=True)

    wh0 = whx[:, :, 0:1, :d]
    z0 = att0[:, :, 0:1, :] * wh0               # centre-row weighted sum
    msum = wh0                                  # running sum for the mean
    for m in range(1, n):                       # N tiny: unrolled VPU FMAs
        whm = whx[:, :, m:m + 1, :d]
        z0 = z0 + att0[:, :, m:m + 1, :] * whm
        msum = msum + whm

    def elu(x):
        # clamp before exp so the inactive branch cannot overflow
        return jnp.where(x > 0, x, jnp.exp(jnp.minimum(x, 0.0)) - 1.0)

    z0 = elu(z0).reshape(g, t, d)               # centre-node GAT output
    zr = elu(msum * (1.0 / n)).reshape(g, t, d)  # shared non-centre output

    # ---- semantic attention over the T metapaths ---------------------------
    zcat = jnp.concatenate([z0.reshape(gt, d), zr.reshape(gt, d)], axis=0)
    proj = jnp.tanh(jnp.dot(zcat, semw_ref[...],
                            preferred_element_type=jnp.float32)
                    + vec_ref[0:1, :])                        # + b1
    wsc = jnp.sum(proj * vec_ref[1:2, :], axis=-1, keepdims=True)  # (2*GT,1)
    # mean over the N nodes: node 0 score + (N-1) copies of the shared score
    wmean = (wsc[:gt] + (n - 1.0) * wsc[gt:]) * (1.0 / n)
    wmean = wmean.reshape(g, t, 1)
    wmean = wmean - jnp.max(wmean, axis=1, keepdims=True)
    bexp = jnp.exp(wmean)
    beta = bexp * pl.reciprocal(jnp.sum(bexp, axis=1, keepdims=True),
                                approx=True)                  # (G,T,1)

    # beta-weighted metapath sums; the v / `weight` scalars are folded into
    # the output-linear weights in the wrapper, so only two (G,D) contexts
    # are needed here.
    a_ctx = jnp.sum(beta * z0, axis=1)          # (G, D)
    b_ctx = jnp.sum(beta * zr, axis=1)          # (G, D)

    # ---- fused output Linear (single MXU matmul) + cosine similarity -------
    node_flat = node_ref[...].reshape(g, d)
    xcat = jnp.concatenate([node_flat, a_ctx, b_ctx], axis=-1)   # (G, 3D)
    o = jnp.dot(xcat, outw_ref[...],
                preferred_element_type=jnp.float32) + outb_ref[...]
    o0 = o[:bb]                                 # side 0 contexts (B, O_pad)
    o1 = o[bb:]                                 # side 1 contexts
    dot01 = jnp.sum(o0 * o1, axis=-1, keepdims=True)
    sq0 = jnp.sum(o0 * o0, axis=-1, keepdims=True)
    sq1 = jnp.sum(o1 * o1, axis=-1, keepdims=True)
    sim = dot01 * jax.lax.rsqrt(jnp.maximum(sq0 * sq1, 1e-16))
    sim_ref[...] = jnp.broadcast_to(sim, sim_ref.shape)      # lane-dense store


def _pick_block_batch(b):
    """Bb: multiple of 8 dividing B with >=2 grid steps; else the full batch."""
    if b < 16 or b % 8 != 0:
        return b
    bb = 8
    for cand in range(8, min(b // 2, 64) + 1, 8):
        if b % cand == 0:
            bb = cand
    return bb


def run_siamhan_fused(h, node_emb, gat_w_ext, sem_w, vec_pack, out_w_eff,
                      out_b_pad, *, n_types, n_nodes):
    two, b, d = node_emb.shape
    assert two == 2
    bb = _pick_block_batch(b)
    assert b % bb == 0                       # no ragged tail -> no garbage rows
    grid = (b // bb,)
    h_flat = h.reshape(2, b * n_types * n_nodes, d)   # lane-dense DMA layout
    sims = pl.pallas_call(
        functools.partial(siamhan_fused_kernel, alpha=0.2,
                          n_types=n_types, n_nodes=n_nodes),
        out_shape=jax.ShapeDtypeStruct((b, 128), jnp.float32),
        grid=grid,
        in_specs=[
            pl.BlockSpec((2, bb * n_types * n_nodes, d), lambda i: (0, i, 0)),
            pl.BlockSpec((2, bb, d), lambda i: (0, i, 0)),
            pl.BlockSpec(gat_w_ext.shape, lambda i: (0, 0)),
            pl.BlockSpec(sem_w.shape, lambda i: (0, 0)),
            pl.BlockSpec(vec_pack.shape, lambda i: (0, 0)),
            pl.BlockSpec(out_w_eff.shape, lambda i: (0, 0)),
            pl.BlockSpec(out_b_pad.shape, lambda i: (0, 0)),
        ],
        out_specs=pl.BlockSpec((bb, 128), lambda i: (i, 0)),
        compiler_params=pltpu.CompilerParams(
            dimension_semantics=("parallel",),
            vmem_limit_bytes=32 * 1024 * 1024),
    )(h_flat, node_emb, gat_w_ext, sem_w, vec_pack, out_w_eff, out_b_pad)
    return sims[:, 0]


# ----------------------------------------------------------------------------
# SiamHAN forward (glue in plain JAX: embedding gathers, graph construction,
# parameter folding, prop-branch small reductions).
# ----------------------------------------------------------------------------
def siamhan_forward(params, nodes, features, prop_nodes, prop_features,
                    max_prop_len):
    del max_prop_len  # stored but unused by the reference forward
    f32 = jnp.float32
    emb = params['emb']                                  # (V, D), row 0 == 0
    D = emb.shape[1]
    B = nodes.shape[0]
    T = features.shape[2]
    P = features.shape[4]
    N = P + 1

    nodes_t = jnp.transpose(nodes, (1, 0))                   # (2, B)
    features_t = jnp.transpose(features, (1, 0, 2, 3, 4))    # (2, B, T, Paths, P)

    node_emb = jnp.take(emb, nodes_t, axis=0)                # (2, B, D)
    feat_emb = jnp.take(emb, features_t, axis=0)             # (2, B, T, Paths, P, D)

    # create_graph_freatures: if every path's first scalar is 0 -> all-zero
    # graph; otherwise [centre node, first path's nodes].
    first_scalar = feat_emb[:, :, :, :, 0, 0]                # (2, B, T, Paths)
    all_zero = jnp.all(first_scalar == 0.0, axis=-1)         # (2, B, T)
    h_nonzero = jnp.concatenate([
        jnp.broadcast_to(node_emb[:, :, None, None, :], (2, B, T, 1, D)),
        feat_emb[:, :, :, 0, :, :],                          # first path only
    ], axis=3)                                               # (2, B, T, N, D)
    h = jnp.where(all_zero[..., None, None], 0.0, h_nonzero).astype(f32)
    node_emb32 = node_emb.astype(f32)

    # Fold the a1/a2 attention vectors into two extra MXU columns of gat_W.
    gat_W = params['gat_W'].astype(f32)                      # (D, D)
    gat_a = params['gat_a'].astype(f32)                      # (2, D)
    gat_W_ext = jnp.concatenate([gat_W, jnp.dot(gat_W, gat_a.T)], axis=1)

    # Pack the semantic-attention vectors (b1, q) into one small tile.
    vec_pack = jnp.concatenate([params['sem_b1'], params['sem_q']],
                               axis=0).astype(f32)           # (2, D)

    # Fold `weight` and the v path-position weights into the output Linear:
    # h_prime = weight * sum_t beta_t * (v0*z0 + sum(v[1:])*zr), and the
    # output Linear is linear, so scale its h_prime half by v0 / v_rest.
    v_flat = params['v'].astype(f32).reshape(-1)             # (N,)
    weight = params['weight'].astype(f32)
    v0 = weight * v_flat[0]
    vr = weight * jnp.sum(v_flat[1:])
    out_W = params['out_W'].astype(f32)                      # (2D, 300)
    out_b = params['out_b'].astype(f32)                      # (1, 300)
    O = out_W.shape[1]
    O_pad = ((O + 127) // 128) * 128
    w_top = out_W[:D]
    w_bot = out_W[D:]
    out_W_eff = jnp.concatenate([w_top, v0 * w_bot, vr * w_bot], axis=0)
    out_W_pad = jnp.zeros((3 * D, O_pad), f32).at[:, :O].set(out_W_eff)
    out_b_pad = jnp.zeros((1, O_pad), f32).at[:, :O].set(out_b)

    sim_ent = run_siamhan_fused(h, node_emb32, gat_W_ext,
                                params['sem_W1'].astype(f32),
                                vec_pack, out_W_pad, out_b_pad,
                                n_types=T, n_nodes=N)        # (B,)

    if prop_nodes.size != 0:
        prop_emb = jnp.take(emb, prop_features, axis=0)      # (B, 2, 3, L, D)
        agg = jnp.sum(prop_emb, axis=-2)                     # (B, 2, 3, D)

        def cos(a, c):
            na = jnp.sqrt(jnp.sum(a * a, -1))
            nc = jnp.sqrt(jnp.sum(c * c, -1))
            return jnp.sum(a * c, -1) / jnp.maximum(na * nc, 1e-8)

        wp = params['weight_prop']
        sim_prop = (wp * cos(agg[:, 0, 0], agg[:, 1, 0])
                    + wp * cos(agg[:, 0, 1], agg[:, 1, 1])
                    + (1.0 - 2.0 * wp) * cos(agg[:, 0, 2], agg[:, 1, 2]))
        return jnp.concatenate([sim_ent, sim_prop])
    return sim_ent


if __name__ == "__main__":
    key = jax.random.PRNGKey(0)
    V, D = 50, 32                 # vocab size, embedding dim
    B, T, PATHS, P = 2, 3, 2, 3   # batch, max_types, max_paths, max_pathlen
    N = P + 1
    L = 2                         # prop path length

    keys = jax.random.split(key, 12)
    emb = jax.random.normal(keys[0], (V, D), jnp.float32) * 0.5
    emb = emb.at[0].set(0.0)      # index 0 acts as padding (zero embedding)

    params = dict(
        emb=emb,
        gat_W=jax.random.normal(keys[1], (D, D), jnp.float32) * 0.1,
        gat_a=jax.random.normal(keys[2], (2, D), jnp.float32) * 0.1,
        sem_W1=jax.random.normal(keys[3], (D, D), jnp.float32) * 0.1,
        sem_b1=jax.random.normal(keys[4], (1, D), jnp.float32) * 0.1,
        sem_q=jax.random.normal(keys[5], (1, D), jnp.float32) * 0.1,
        out_W=jax.random.normal(keys[6], (2 * D, 300), jnp.float32) * 0.1,
        out_b=jax.random.normal(keys[7], (1, 300), jnp.float32) * 0.1,
        v=jnp.full((1, N), 1.0 / (P + 1), jnp.float32),
        weight=jnp.float32(1.0),
        weight_prop=jnp.float32(0.33),
    )

    nodes = jax.random.randint(keys[8], (B, 2), 1, V)
    features = jax.random.randint(keys[9], (B, 2, T, PATHS, P), 0, V)
    # force one (sample, side, type) group to all-padding so the "all zero"
    # branch of create_graph_freatures is exercised
    features = features.at[0, 0, 1].set(0)

    prop_nodes = jnp.ones((B, 2), jnp.int32)
    prop_features = jax.random.randint(keys[10], (B, 2, 3, L), 0, V)

    out = siamhan_forward(params, nodes, features, prop_nodes, prop_features,
                          max_prop_len=L)
    jax.block_until_ready(out)
    assert out.shape == (2 * B,)
    print("KERNEL_OK")
</pallas_src>

<mosaic_0001>
module attributes {stable_mosaic.version = 11 : i64} {
  func.func @siamhan_fused_kernel(%arg0: i32, %arg1: memref<2x24x32xf32, #tpu.memory_space<vmem>>, %arg2: memref<2x2x32xf32, #tpu.memory_space<vmem>>, %arg3: memref<32x34xf32, #tpu.memory_space<vmem>>, %arg4: memref<32x32xf32, #tpu.memory_space<vmem>>, %arg5: memref<2x32xf32, #tpu.memory_space<vmem>>, %arg6: memref<96x384xf32, #tpu.memory_space<vmem>>, %arg7: memref<1x384xf32, #tpu.memory_space<vmem>>, %arg8: memref<2x128xf32, #tpu.memory_space<vmem>>) attributes {dimension_semantics = [#tpu.dimension_semantics<parallel>], iteration_bounds = array<i64: 1>, scalar_prefetch = 0 : i64, scratch_operands = 0 : i64, tpu.core_type = #tpu.core_type<tc>, window_params = [{transform_indices = @transform_0, window_bounds = array<i64: 2, 24, 32>}, {transform_indices = @transform_1, window_bounds = array<i64: 2, 2, 32>}, {pipeline_mode = #tpu.pipeline_mode<synchronous>, transform_indices = @transform_2, window_bounds = array<i64: 32, 34>}, {pipeline_mode = #tpu.pipeline_mode<synchronous>, transform_indices = @transform_3, window_bounds = array<i64: 32, 32>}, {pipeline_mode = #tpu.pipeline_mode<synchronous>, transform_indices = @transform_4, window_bounds = array<i64: 2, 32>}, {pipeline_mode = #tpu.pipeline_mode<synchronous>, transform_indices = @transform_5, window_bounds = array<i64: 96, 384>}, {pipeline_mode = #tpu.pipeline_mode<synchronous>, transform_indices = @transform_6, window_bounds = array<i64: 1, 384>}, {transform_indices = @transform_7, window_bounds = array<i64: 2, 128>}]} {
    %c0 = arith.constant 0 : index
    %c0_0 = arith.constant 0 : index
    %c0_1 = arith.constant 0 : index
    %0 = vector.load %arg1[%c0, %c0_0, %c0_1] : memref<2x24x32xf32, #tpu.memory_space<vmem>>, vector<2x24x32xf32>
    %1 = vector.shape_cast %0 : vector<2x24x32xf32> to vector<48x32xf32>
    %c0_2 = arith.constant 0 : index
    %c0_3 = arith.constant 0 : index
    %2 = vector.load %arg3[%c0_2, %c0_3] : memref<32x34xf32, #tpu.memory_space<vmem>>, vector<32x34xf32>
    %cst = arith.constant dense<0.000000e+00> : vector<48x34xf32>
    %3 = tpu.matmul %1, %2, %cst {dimension_numbers = #tpu.dot_dimension_numbers<[1], [0], [0], [1], [0, 0, 1, 1], [], []>} : vector<48x32xf32>, vector<32x34xf32>, vector<48x34xf32> -> vector<48x34xf32>
    %4 = vector.shape_cast %3 : vector<48x34xf32> to vector<4x3x4x34xf32>
    %5 = vector.extract_strided_slice %4 {offsets = [0, 0, 0, 32], sizes = [4, 3, 1, 1], strides = [1, 1, 1, 1]} : vector<4x3x4x34xf32> to vector<4x3x1x1xf32>
    %6 = vector.extract_strided_slice %4 {offsets = [0, 0, 0, 33], sizes = [4, 3, 4, 1], strides = [1, 1, 1, 1]} : vector<4x3x4x34xf32> to vector<4x3x4x1xf32>
    %7 = vector.broadcast %5 : vector<4x3x1x1xf32> to vector<4x3x4x1xf32>
    %8 = arith.addf %7, %6 : vector<4x3x4x1xf32>
    %cst_4 = arith.constant 0.000000e+00 : f32
    %9 = vector.broadcast %cst_4 : f32 to vector<4x3x4x1xf32>
    %10 = arith.cmpf ogt, %8, %9 : vector<4x3x4x1xf32>
    %cst_5 = arith.constant 2.000000e-01 : f32
    %11 = vector.broadcast %cst_5 : f32 to vector<4x3x4x1xf32>
    %12 = arith.mulf %11, %8 : vector<4x3x4x1xf32>
    %13 = arith.select %10, %8, %12 : vector<4x3x4x1xi1>, vector<4x3x4x1xf32>
    %cst_6 = arith.constant dense<0xFF800000> : vector<4x3x1xf32>
    %14 = vector.multi_reduction <maximumf>, %13, %cst_6 [2] : vector<4x3x4x1xf32> to vector<4x3x1xf32>
    %15 = vector.shape_cast %14 : vector<4x3x1xf32> to vector<4x3x1x1xf32>
    %16 = vector.broadcast %15 : vector<4x3x1x1xf32> to vector<4x3x4x1xf32>
    %17 = arith.subf %13, %16 : vector<4x3x4x1xf32>
    %18 = math.exp %17 : vector<4x3x4x1xf32>
    %cst_7 = arith.constant dense<0.000000e+00> : vector<4x3x1xf32>
    %19 = vector.multi_reduction <add>, %18, %cst_7 [2] : vector<4x3x4x1xf32> to vector<4x3x1xf32>
    %20 = vector.shape_cast %19 : vector<4x3x1xf32> to vector<4x3x1x1xf32>
    %21 = tpu.reciprocal %20 {approx = true} : vector<4x3x1x1xf32> -> vector<4x3x1x1xf32>
    %22 = vector.broadcast %21 : vector<4x3x1x1xf32> to vector<4x3x4x1xf32>
    %23 = arith.mulf %18, %22 : vector<4x3x4x1xf32>
    %24 = vector.extract_strided_slice %4 {offsets = [0, 0, 0, 0], sizes = [4, 3, 1, 32], strides = [1, 1, 1, 1]} : vector<4x3x4x34xf32> to vector<4x3x1x32xf32>
    %25 = vector.extract_strided_slice %23 {offsets = [0, 0, 0, 0], sizes = [4, 3, 1, 1], strides = [1, 1, 1, 1]} : vector<4x3x4x1xf32> to vector<4x3x1x1xf32>
    %26 = vector.broadcast %25 : vector<4x3x1x1xf32> to vector<4x3x1x32xf32>
    %27 = arith.mulf %26, %24 : vector<4x3x1x32xf32>
    %28 = vector.extract_strided_slice %4 {offsets = [0, 0, 1, 0], sizes = [4, 3, 1, 32], strides = [1, 1, 1, 1]} : vector<4x3x4x34xf32> to vector<4x3x1x32xf32>
    %29 = vector.extract_strided_slice %23 {offsets = [0, 0, 1, 0], sizes = [4, 3, 1, 1], strides = [1, 1, 1, 1]} : vector<4x3x4x1xf32> to vector<4x3x1x1xf32>
    %30 = vector.broadcast %29 : vector<4x3x1x1xf32> to vector<4x3x1x32xf32>
    %31 = arith.mulf %30, %28 : vector<4x3x1x32xf32>
    %32 = arith.addf %27, %31 : vector<4x3x1x32xf32>
    %33 = arith.addf %24, %28 : vector<4x3x1x32xf32>
    %34 = vector.extract_strided_slice %4 {offsets = [0, 0, 2, 0], sizes = [4, 3, 1, 32], strides = [1, 1, 1, 1]} : vector<4x3x4x34xf32> to vector<4x3x1x32xf32>
    %35 = vector.extract_strided_slice %23 {offsets = [0, 0, 2, 0], sizes = [4, 3, 1, 1], strides = [1, 1, 1, 1]} : vector<4x3x4x1xf32> to vector<4x3x1x1xf32>
    %36 = vector.broadcast %35 : vector<4x3x1x1xf32> to vector<4x3x1x32xf32>
    %37 = arith.mulf %36, %34 : vector<4x3x1x32xf32>
    %38 = arith.addf %32, %37 : vector<4x3x1x32xf32>
    %39 = arith.addf %33, %34 : vector<4x3x1x32xf32>
    %40 = vector.extract_strided_slice %4 {offsets = [0, 0, 3, 0], sizes = [4, 3, 1, 32], strides = [1, 1, 1, 1]} : vector<4x3x4x34xf32> to vector<4x3x1x32xf32>
    %41 = vector.extract_strided_slice %23 {offsets = [0, 0, 3, 0], sizes = [4, 3, 1, 1], strides = [1, 1, 1, 1]} : vector<4x3x4x1xf32> to vector<4x3x1x1xf32>
    %42 = vector.broadcast %41 : vector<4x3x1x1xf32> to vector<4x3x1x32xf32>
    %43 = arith.mulf %42, %40 : vector<4x3x1x32xf32>
    %44 = arith.addf %38, %43 : vector<4x3x1x32xf32>
    %45 = arith.addf %39, %40 : vector<4x3x1x32xf32>
    %cst_8 = arith.constant 0.000000e+00 : f32
    %46 = vector.broadcast %cst_8 : f32 to vector<4x3x1x32xf32>
    %47 = arith.cmpf ogt, %44, %46 : vector<4x3x1x32xf32>
    %cst_9 = arith.constant 0.000000e+00 : f32
    %48 = vector.broadcast %cst_9 : f32 to vector<4x3x1x32xf32>
    %49 = arith.minimumf %44, %48 : vector<4x3x1x32xf32>
    %50 = math.exp %49 : vector<4x3x1x32xf32>
    %cst_10 = arith.constant 1.000000e+00 : f32
    %51 = vector.broadcast %cst_10 : f32 to vector<4x3x1x32xf32>
    %52 = arith.subf %50, %51 : vector<4x3x1x32xf32>
    %53 = arith.select %47, %44, %52 : vector<4x3x1x32xi1>, vector<4x3x1x32xf32>
    %54 = vector.shape_cast %53 : vector<4x3x1x32xf32> to vector<4x3x32xf32>
    %cst_11 = arith.constant 2.500000e-01 : f32
    %55 = vector.broadcast %cst_11 : f32 to vector<4x3x1x32xf32>
    %56 = arith.mulf %45, %55 : vector<4x3x1x32xf32>
    %cst_12 = arith.constant 0.000000e+00 : f32
    %57 = vector.broadcast %cst_12 : f32 to vector<4x3x1x32xf32>
    %58 = arith.cmpf ogt, %56, %57 : vector<4x3x1x32xf32>
    %cst_13 = arith.constant 0.000000e+00 : f32
    %59 = vector.broadcast %cst_13 : f32 to vector<4x3x1x32xf32>
    %60 = arith.minimumf %56, %59 : vector<4x3x1x32xf32>
    %61 = math.exp %60 : vector<4x3x1x32xf32>
    %cst_14 = arith.constant 1.000000e+00 : f32
    %62 = vector.broadcast %cst_14 : f32 to vector<4x3x1x32xf32>
    %63 = arith.subf %61, %62 : vector<4x3x1x32xf32>
    %64 = arith.select %58, %56, %63 : vector<4x3x1x32xi1>, vector<4x3x1x32xf32>
    %65 = vector.shape_cast %64 : vector<4x3x1x32xf32> to vector<4x3x32xf32>
    %66 = vector.shape_cast %54 : vector<4x3x32xf32> to vector<12x32xf32>
    %67 = vector.shape_cast %65 : vector<4x3x32xf32> to vector<12x32xf32>
    %68 = tpu.concatenate %66, %67 in 0 : vector<12x32xf32>, vector<12x32xf32> -> vector<24x32xf32>
    %c0_15 = arith.constant 0 : index
    %c0_16 = arith.constant 0 : index
    %69 = vector.load %arg4[%c0_15, %c0_16] : memref<32x32xf32, #tpu.memory_space<vmem>>, vector<32x32xf32>
    %cst_17 = arith.constant dense<0.000000e+00> : vector<24x32xf32>
    %70 = tpu.matmul %68, %69, %cst_17 {dimension_numbers = #tpu.dot_dimension_numbers<[1], [0], [0], [1], [0, 0, 1, 1], [], []>} : vector<24x32xf32>, vector<32x32xf32>, vector<24x32xf32> -> vector<24x32xf32>
    %c0_18 = arith.constant 0 : index
    %c0_19 = arith.constant 0 : index
    %71 = vector.load %arg5[%c0_18, %c0_19] : memref<2x32xf32, #tpu.memory_space<vmem>>, vector<1x32xf32>
    %72 = vector.broadcast %71 : vector<1x32xf32> to vector<24x32xf32>
    %73 = arith.addf %70, %72 : vector<24x32xf32>
    %74 = math.tanh %73 : vector<24x32xf32>
    %c1 = arith.constant 1 : index
    %c0_20 = arith.constant 0 : index
    %75 = vector.load %arg5[%c1, %c0_20] : memref<2x32xf32, #tpu.memory_space<vmem>>, vector<1x32xf32>
    %76 = vector.broadcast %75 : vector<1x32xf32> to vector<24x32xf32>
    %77 = arith.mulf %74, %76 : vector<24x32xf32>
    %cst_21 = arith.constant dense<0.000000e+00> : vector<24xf32>
    %78 = vector.multi_reduction <add>, %77, %cst_21 [1] : vector<24x32xf32> to vector<24xf32>
    %79 = vector.shape_cast %78 : vector<24xf32> to vector<24x1xf32>
    %80 = vector.extract_strided_slice %79 {offsets = [0, 0], sizes = [12, 1], strides = [1, 1]} : vector<24x1xf32> to vector<12x1xf32>
    %81 = vector.extract_strided_slice %79 {offsets = [12, 0], sizes = [12, 1], strides = [1, 1]} : vector<24x1xf32> to vector<12x1xf32>
    %cst_22 = arith.constant 3.000000e+00 : f32
    %82 = vector.broadcast %cst_22 : f32 to vector<12x1xf32>
    %83 = arith.mulf %82, %81 : vector<12x1xf32>
    %84 = arith.addf %80, %83 : vector<12x1xf32>
    %cst_23 = arith.constant 2.500000e-01 : f32
    %85 = vector.broadcast %cst_23 : f32 to vector<12x1xf32>
    %86 = arith.mulf %84, %85 : vector<12x1xf32>
    %87 = vector.shape_cast %86 : vector<12x1xf32> to vector<4x3x1xf32>
    %cst_24 = arith.constant dense<0xFF800000> : vector<4x1xf32>
    %88 = vector.multi_reduction <maximumf>, %87, %cst_24 [1] : vector<4x3x1xf32> to vector<4x1xf32>
    %89 = vector.shape_cast %88 : vector<4x1xf32> to vector<4x1x1xf32>
    %90 = vector.broadcast %89 : vector<4x1x1xf32> to vector<4x3x1xf32>
    %91 = arith.subf %87, %90 : vector<4x3x1xf32>
    %92 = math.exp %91 : vector<4x3x1xf32>
    %cst_25 = arith.constant dense<0.000000e+00> : vector<4x1xf32>
    %93 = vector.multi_reduction <add>, %92, %cst_25 [1] : vector<4x3x1xf32> to vector<4x1xf32>
    %94 = vector.shape_cast %93 : vector<4x1xf32> to vector<4x1x1xf32>
    %95 = tpu.reciprocal %94 {approx = true} : vector<4x1x1xf32> -> vector<4x1x1xf32>
    %96 = vector.broadcast %95 : vector<4x1x1xf32> to vector<4x3x1xf32>
    %97 = arith.mulf %92, %96 : vector<4x3x1xf32>
    %98 = vector.broadcast %97 : vector<4x3x1xf32> to vector<4x3x32xf32>
    %99 = arith.mulf %98, %54 : vector<4x3x32xf32>
    %cst_26 = arith.constant dense<0.000000e+00> : vector<4x32xf32>
    %100 = vector.multi_reduction <add>, %99, %cst_26 [1] : vector<4x3x32xf32> to vector<4x32xf32>
    %101 = vector.broadcast %97 : vector<4x3x1xf32> to vector<4x3x32xf32>
    %102 = arith.mulf %101, %65 : vector<4x3x32xf32>
    %cst_27 = arith.constant dense<0.000000e+00> : vector<4x32xf32>
    %103 = vector.multi_reduction <add>, %102, %cst_27 [1] : vector<4x3x32xf32> to vector<4x32xf32>
    %c0_28 = arith.constant 0 : index
    %c0_29 = arith.constant 0 : index
    %c0_30 = arith.constant 0 : index
    %104 = vector.load %arg2[%c0_28, %c0_29, %c0_30] : memref<2x2x32xf32, #tpu.memory_space<vmem>>, vector<2x2x32xf32>
    %105 = vector.shape_cast %104 : vector<2x2x32xf32> to vector<4x32xf32>
    %106 = tpu.concatenate %105, %100, %103 in 1 : vector<4x32xf32>, vector<4x32xf32>, vector<4x32xf32> -> vector<4x96xf32>
    %c0_31 = arith.constant 0 : index
    %c0_32 = arith.constant 0 : index
    %107 = vector.load %arg6[%c0_31, %c0_32] : memref<96x384xf32, #tpu.memory_space<vmem>>, vector<96x384xf32>
    %cst_33 = arith.constant dense<0.000000e+00> : vector<4x384xf32>
    %108 = tpu.matmul %106, %107, %cst_33 {dimension_numbers = #tpu.dot_dimension_numbers<[1], [0], [0], [1], [0, 0, 1, 1], [], []>} : vector<4x96xf32>, vector<96x384xf32>, vector<4x384xf32> -> vector<4x384xf32>
    %c0_34 = arith.constant 0 : index
    %c0_35 = arith.constant 0 : index
    %109 = vector.load %arg7[%c0_34, %c0_35] : memref<1x384xf32, #tpu.memory_space<vmem>>, vector<1x384xf32>
    %110 = vector.broadcast %109 : vector<1x384xf32> to vector<4x384xf32>
    %111 = arith.addf %108, %110 : vector<4x384xf32>
    %112 = vector.extract_strided_slice %111 {offsets = [0, 0], sizes = [2, 384], strides = [1, 1]} : vector<4x384xf32> to vector<2x384xf32>
    %113 = vector.extract_strided_slice %111 {offsets = [2, 0], sizes = [2, 384], strides = [1, 1]} : vector<4x384xf32> to vector<2x384xf32>
    %114 = arith.mulf %112, %113 : vector<2x384xf32>
    %cst_36 = arith.constant dense<0.000000e+00> : vector<2xf32>
    %115 = vector.multi_reduction <add>, %114, %cst_36 [1] : vector<2x384xf32> to vector<2xf32>
    %116 = vector.shape_cast %115 : vector<2xf32> to vector<2x1xf32>
    %117 = arith.mulf %112, %112 : vector<2x384xf32>
    %cst_37 = arith.constant dense<0.000000e+00> : vector<2xf32>
    %118 = vector.multi_reduction <add>, %117, %cst_37 [1] : vector<2x384xf32> to vector<2xf32>
    %119 = vector.shape_cast %118 : vector<2xf32> to vector<2x1xf32>
    %120 = arith.mulf %113, %113 : vector<2x384xf32>
    %cst_38 = arith.constant dense<0.000000e+00> : vector<2xf32>
    %121 = vector.multi_reduction <add>, %120, %cst_38 [1] : vector<2x384xf32> to vector<2xf32>
    %122 = vector.shape_cast %121 : vector<2xf32> to vector<2x1xf32>
    %123 = arith.mulf %119, %122 : vector<2x1xf32>
    %cst_39 = arith.constant 1.000000e-16 : f32
    %124 = vector.broadcast %cst_39 : f32 to vector<2x1xf32>
    %125 = arith.maximumf %123, %124 : vector<2x1xf32>
    %126 = math.rsqrt %125 : vector<2x1xf32>
    %127 = arith.mulf %116, %126 : vector<2x1xf32>
    %128 = vector.shape_cast %127 : vector<2x1xf32> to vector<2x1xf32>
    %129 = vector.broadcast %128 : vector<2x1xf32> to vector<2x128xf32>
    %c0_40 = arith.constant 0 : index
    %c0_41 = arith.constant 0 : index
    %130 = vector.load %arg8[%c0_40, %c0_41] : memref<2x128xf32, #tpu.memory_space<vmem>>, vector<2x128xf32>
    tpu.vector_store %arg8[%c0_40, %c0_41], %129 {strides = array<i32>} : memref<2x128xf32, #tpu.memory_space<vmem>>, vector<2x128xf32>,
    return
  }
  func.func @transform_0(%arg0: i32) -> (i32, i32, i32) {
    %c0_i32 = arith.constant 0 : i32
    %c0_i32_0 = arith.constant 0 : i32
    %c0_i32_1 = arith.constant 0 : i32
    return %c0_i32, %arg0, %c0_i32_0 : i32, i32, i32
  }
  func.func @transform_1(%arg0: i32) -> (i32, i32, i32) {
    %c0_i32 = arith.constant 0 : i32
    %c0_i32_0 = arith.constant 0 : i32
    %c0_i32_1 = arith.constant 0 : i32
    return %c0_i32, %arg0, %c0_i32_0 : i32, i32, i32
  }
  func.func @transform_2(%arg0: i32) -> (i32, i32) {
    %c0_i32 = arith.constant 0 : i32
    %c0_i32_0 = arith.constant 0 : i32
    %c0_i32_1 = arith.constant 0 : i32
    return %c0_i32, %c0_i32_0 : i32, i32
  }
  func.func @transform_3(%arg0: i32) -> (i32, i32) {
    %c0_i32 = arith.constant 0 : i32
    %c0_i32_0 = arith.constant 0 : i32
    %c0_i32_1 = arith.constant 0 : i32
    return %c0_i32, %c0_i32_0 : i32, i32
  }
  func.func @transform_4(%arg0: i32) -> (i32, i32) {
    %c0_i32 = arith.constant 0 : i32
    %c0_i32_0 = arith.constant 0 : i32
    %c0_i32_1 = arith.constant 0 : i32
    return %c0_i32, %c0_i32_0 : i32, i32
  }
  func.func @transform_5(%arg0: i32) -> (i32, i32) {
    %c0_i32 = arith.constant 0 : i32
    %c0_i32_0 = arith.constant 0 : i32
    %c0_i32_1 = arith.constant 0 : i32
    return %c0_i32, %c0_i32_0 : i32, i32
  }
  func.func @transform_6(%arg0: i32) -> (i32, i32) {
    %c0_i32 = arith.constant 0 : i32
    %c0_i32_0 = arith.constant 0 : i32
    %c0_i32_1 = arith.constant 0 : i32
    return %c0_i32, %c0_i32_0 : i32, i32
  }
  func.func @transform_7(%arg0: i32) -> (i32, i32) {
    %c0_i32 = arith.constant 0 : i32
    %c0_i32_0 = arith.constant 0 : i32
    return %arg0, %c0_i32 : i32, i32
  }
}

</mosaic_0001>

<bundles_post_ra>
// kernel: tpu_custom_call.1
= control target key start
LH: loop header
LB: loop body
LE: loop exit
PB: predicated region body
PF: predicated region fallthrough
CT: control target
= control target key end

     0   :  { %12 = vsyncpa [#allocation3], 0  ;;  %s3104_s0 = inlined_call_operand.hbm [shape: f32[2,24,32], index: 0, kind: input, shape index: {}]   ;;  %s3105_s1 = inlined_call_operand.hbm [shape: f32[2,2,32], index: 1, kind: input, shape index: {}]   ;;  %s3106_s2 = inlined_call_operand.hbm [shape: f32[32,34], index: 2, kind: input, shape index: {}]   ;;  %s3107_s3 = inlined_call_operand.hbm [shape: f32[32,32], index: 3, kind: input, shape index: {}]   ;;  %s3108_s4 = inlined_call_operand.vmem [shape: f32[2,32], index: 4, kind: input, shape index: {}]   ;;  %s3109_s5 = inlined_call_operand.hbm [shape: f32[96,384], index: 5, kind: input, shape index: {}]   ;;  %s3110_s6 = inlined_call_operand.vmem [shape: f32[1,384], index: 6, kind: input, shape index: {}]   ;;  %s3111_s7 = inlined_call_operand.hbm [shape: f32[2,128], index: 7, kind: output, shape index: {}]  }
   0x1   :  { %13 = vsyncpa [#allocation6], 0 }
   0x2   :  { %14 = vsyncpa [#allocation9], 0  ;;  %s33_s26 = sshll.u32 %s3105_s1, 4  ;;  %s34_s26 = int_to_ptr.hbm [resolvable:$true] %s33_s26 }
   0x3   :  { %15 = vsyncpa [#allocation4], 0  ;;  %s2265_s27 = smov [#allocation5]   ;;  %s2266_s29 = smov 32  }
   0x4   :  { %s35_s28 = sshll.u32 %s2265_s27, 4  ;;  %s2267_s30 = smov 2   ;;  %s36_s28 = int_to_ptr.vmem [resolvable:$true] %s35_s28 }
   0x5   :  { %41 = dma.hbm_to_vmem [thread:$0]  %s34_s26, 64, %s36_s28, [#allocation6], %s2266_s29, %s2266_s29, %s2267_s30  }
   0x6   :  { %s59_s10 = sshll.u32 %s3107_s3, 4  ;;  %s2268_s11 = smov [#allocation8]   ;;  %s60_s10 = int_to_ptr.hbm [resolvable:$true] %s59_s10 }
   0x7   :  { %s61_s12 = sshll.u32 %s2268_s11, 4  ;;  %s20_s1 = sshll.u32 %s3104_s0, 4  ;;  %s62_s12 = int_to_ptr.vmem [resolvable:$true] %s61_s12  ;;  %s21_s1 = int_to_ptr.hbm [resolvable:$true] %s20_s1 }
   0x8   :  { %s2269_s15 = smov 128   ;;  %s2270_s16 = smov 8  }
   0x9   :  { %67 = dma.hbm_to_vmem [thread:$0]  %s60_s10, 512, %s62_s12, [#allocation9], %s2269_s15, %s2269_s15, %s2270_s16  }
   0xa   :  { %s46_s19 = sshll.u32 %s3106_s2, 4  ;;  %s2271_s20 = smov [#allocation2]   ;;  %s47_s19 = int_to_ptr.hbm [resolvable:$true] %s46_s19 }
   0xb   :  { %s22_s21 = sshll.u32 %s2271_s20, 4  ;;  %s2272_s3 = smov [#allocation7]   ;;  %s23_s21 = int_to_ptr.vmem [resolvable:$true] %s22_s21 }
   0xc   :  { %28 = dma.hbm_to_vmem [thread:$0]  %s21_s1, 768, %s23_s21, [#allocation3], %s2269_s15, %s2269_s15, %s2270_s16  }
   0xd   :  { %s48_s22 = sshll.u32 %s2272_s3, 4  ;;  %s74_s0 = sshll.u32 %s3109_s5, 4  ;;  %s49_s22 = int_to_ptr.vmem [resolvable:$true] %s48_s22  ;;  %s75_s0 = int_to_ptr.hbm [resolvable:$true] %s74_s0 }
   0xe   :  { %54 = dma.hbm_to_vmem [thread:$0]  %s47_s19, 512, %s49_s22, [#allocation6], %s2269_s15, %s2269_s15, %s2270_s16  }
   0xf   :  { %s2273_s25 = smov [#allocation10]   ;;  %s2274_s27 = smov 384  }
  0x10   :  { %s76_s26 = sshll.u32 %s2273_s25, 4  ;;  %s2275_s28 = smov 24   ;;  %s77_s26 = int_to_ptr.vmem [resolvable:$true] %s76_s26 }
  0x11   :  { %82 = dma.hbm_to_vmem [thread:$0]  %s75_s0, 4608, %s77_s26, [#allocation9], %s2274_s27, %s2274_s27, %s2275_s28  }
  0x12   :  { %2257 = dma.done.wait [#allocation3], 768  }
  0x13   :  { %2258 = vsyncadd [#allocation3], 4294966528 }
  0x14   :  { %2259 = dma.done.wait [#allocation6], 576  }
  0x15   :  { %2260 = vsyncadd [#allocation6], 4294966720 }
  0x16   :  { %2261 = dma.done.wait [#allocation9], 5120  }
  0x17   :  { %2262 = vsyncadd [#allocation9], 4294962176  ;;  %v114_v0 = vld [vmem:[#allocation7 + $0x18] sm:$0xff]  ;;  %v113_v1 = vld [vmem:[#allocation7 + $0x10] sm:$0xff]  ;;  %vm115_vm0 = vcmask 261120   ;;  %s2276_s2 = smov 127  }
  0x18   :  { %146 = vmatpush.msra.mxu0 %v114_v0  ;;  %v112_v2 = vld [vmem:[#allocation7 + $0x8] sm:$0xff]  ;;  %v111_v3 = vld [vmem:[#allocation7] sm:$0xff]  ;;  %v106_v5 = vld [vmem:[#allocation2 + $0x8] sm:$0xff]  ;;  %vm310_vm1 = vcmask 265472   ;;  %s1869_s14 = sshll.u32 %s3111_s7, 4  ;;  %s1870_s14 = int_to_ptr.hbm [resolvable:$true] %s1869_s14 }
  0x19   :  { %v105_v4 = vld [vmem:[#allocation2] sm:$0xff]  ;;  %v107_v6 = vld [vmem:[#allocation2 + $0x10] sm:$0xff]  ;;  %v108_v7 = vld [vmem:[#allocation2 + $0x18] sm:$0xff] }
  0x1a   :  { %147 = vmatpush.msra.mxu0 %v113_v1  ;;  %v109_v8 = vld [vmem:[#allocation2 + $0x20] sm:$0xff]  ;;  %v110_v9 = vld [vmem:[#allocation2 + $0x28] sm:$0xff] }
  0x1c   :  { %148 = vmatpush.msra.mxu0 %v112_v2 }
  0x1e   :  { %149 = vmatpush.msra.mxu0 %v111_v3 }
  0x1f   :  { %1881 = vmatmul.msk.f32.vlgmr.msra.gmra.mxu0 %vm115_vm0, %v105_v4 }
  0x27   :  { %1882 = vmatmul.msk.f32.gmra.mxu0 %vm115_vm0, %v106_v5 }
  0x2f   :  { %1883 = vmatmul.msk.f32.gmra.mxu0 %vm115_vm0, %v107_v6 }
  0x37   :  { %1884 = vmatmul.msk.f32.gmra.mxu0 %vm115_vm0, %v108_v7 }
  0x3f   :  { %1885 = vmatmul.msk.f32.gmra.mxu0 %vm115_vm0, %v109_v8 }
  0x47   :  { %1886 = vmatmul.msk.f32.gmra.mxu0 %vm115_vm0, %v110_v9 }
  0x9c   :  { %v2344_v10 = vpop.f32.mrf.mxu0 }
  0x9d   :  { %v2347_v11 = vrot.slane %v2344_v10, 4  ;;  %199 = vst [vmem:[#allocation1] ss:$2 sm:$0xff] %v2344_v10  ;;  %v187_v41 = vperm.slane %v2344_v10, 0 }
  0x9f   :  { %202 = vst [vmem:[#allocation1 + $0x10] ss:$2 sm:$0xff] %v2347_v11  ;;  %v188_v49 = vperm.slane %v2347_v11, 0 }
  0xa4   :  { %v200_v12 = vld.sshfl [vmem:[#allocation1] sm:$0xff pattern:$0x75316420]  ;;  %v2351_v13 = vpop.f32.mrf.mxu0 }
  0xa5   :  { %v2354_v14 = vrot.slane %v2351_v13, 4  ;;  %205 = vst [vmem:[#allocation1 + $0x20] ss:$2 sm:$0xff] %v2351_v13  ;;  %226 = vrot.lane.b32.xlu1 %v200_v12, %s2276_s2  ;;  %v189_v0 = vperm.slane %v2351_v13, 0 }
  0xa6   :  { %v203_v15 = vld.sshfl [vmem:[#allocation1 + $0x10] sm:$0xff pattern:$0x75316420] }
  0xa7   :  { %208 = vst [vmem:[#allocation1 + $0x30] ss:$2 sm:$0xff] %v2354_v14  ;;  %228 = vrot.lane.b32.xlu0 %v203_v15, %s2276_s2  ;;  %v190_v1 = vperm.slane %v2354_v14, 0 }
  0xac   :  { %v2360_v16 = vpop.f32.mrf.mxu0  ;;  %v206_v18 = vld.sshfl [vmem:[#allocation1 + $0x20] sm:$0xff pattern:$0x75316420] }
  0xad   :  { %v2363_v17 = vrot.slane %v2360_v16, 4  ;;  %210 = vst [vmem:[#allocation1] ss:$2 sm:$0xff] %v2360_v16  ;;  %v191_v34 = vperm.slane %v2360_v16, 0 }
  0xae   :  { %v209_v19 = vld.sshfl [vmem:[#allocation1 + $0x30] sm:$0xff pattern:$0x75316420] }
  0xaf   :  { %212 = vst [vmem:[#allocation1 + $0x10] ss:$2 sm:$0xff] %v2363_v17  ;;  %230 = vrot.lane.b32.xlu0 %v206_v18, %s2276_s2  ;;  %232 = vrot.lane.b32.xlu1 %v209_v19, %s2276_s2  ;;  %v192_v42 = vperm.slane %v2363_v17, 0 }
  0xb4   :  { %v211_v20 = vld.sshfl [vmem:[#allocation1] sm:$0xff pattern:$0x75316420]  ;;  %v2369_v21 = vpop.f32.mrf.mxu0 }
  0xb5   :  { %v2372_v22 = vrot.slane %v2369_v21, 4  ;;  %214 = vst [vmem:[#allocation1 + $0x20] ss:$2 sm:$0xff] %v2369_v21  ;;  %234 = vrot.lane.b32.xlu2 %v211_v20, %s2276_s2  ;;  %v193_v5 = vperm.slane %v2369_v21, 0 }
  0xb6   :  { %v213_v23 = vld.sshfl [vmem:[#allocation1 + $0x10] sm:$0xff pattern:$0x75316420] }
  0xb7   :  { %216 = vst [vmem:[#allocation1 + $0x30] ss:$2 sm:$0xff] %v2372_v22  ;;  %v194_v15 = vperm.slane %v2372_v22, 0 }
  0xbc   :  { %v215_v24 = vld.sshfl [vmem:[#allocation1 + $0x20] sm:$0xff pattern:$0x75316420]  ;;  %v2377_v25 = vpop.f32.mrf.mxu0 }
  0xbd   :  { %v2380_v26 = vrot.slane %v2377_v25, 4  ;;  %218 = vst [vmem:[#allocation1] ss:$2 sm:$0xff] %v2377_v25  ;;  %236 = vrot.lane.b32.xlu2 %v213_v23, %s2276_s2  ;;  %238 = vrot.lane.b32.xlu0 %v215_v24, %s2276_s2 }
  0xbe   :  { %v217_v27 = vld.sshfl [vmem:[#allocation1 + $0x30] sm:$0xff pattern:$0x75316420] }
  0xbf   :  { %220 = vst [vmem:[#allocation1 + $0x10] ss:$2 sm:$0xff] %v2380_v26  ;;  %240 = vrot.lane.b32.xlu1 %v217_v27, %s2276_s2  ;;  %v196_v12 = vperm.slane %v2380_v26, 0 }
  0xc4   :  { %v2387_v28 = vpop.f32.mrf.mxu0  ;;  %v219_v30 = vld.sshfl [vmem:[#allocation1] sm:$0xff pattern:$0x75316420] }
  0xc5   :  { %v2390_v29 = vrot.slane %v2387_v28, 4  ;;  %222 = vst [vmem:[#allocation1 + $0x20] ss:$2 sm:$0xff] %v2387_v28 }
  0xc6   :  { %v221_v31 = vld.sshfl [vmem:[#allocation1 + $0x10] sm:$0xff pattern:$0x75316420] }
  0xc7   :  { %224 = vst [vmem:[#allocation1 + $0x30] ss:$2 sm:$0xff] %v2390_v29  ;;  %242 = vrot.lane.b32.xlu1 %v219_v30, %s2276_s2  ;;  %244 = vrot.lane.b32.xlu2 %v221_v31, %s2276_s2 }
  0xcc   :  { %v223_v32 = vld.sshfl [vmem:[#allocation1 + $0x20] sm:$0xff pattern:$0x75316420] }
  0xcd   :  { %246 = vrot.lane.b32.xlu0 %v223_v32, %s2276_s2  ;;  %v195_v32 = vperm.slane %v2377_v25, 0 }
  0xce   :  { %v225_v33 = vld.sshfl [vmem:[#allocation1 + $0x30] sm:$0xff pattern:$0x75316420] }
  0xcf   :  { %248 = vrot.lane.b32.xlu2 %v225_v33, %s2276_s2 }
 0x10f   :  { %v235_v35 = vpop.permute.xlu2 %234 }
 0x110   :  { %v266_v36 = vadd.f32 %v235_v35, %v191_v34 }
 0x112   :  { %vm278_vm2 = vcmp.gt.f32.partialorder %v266_v36, 0.0  ;;  %v290_v37 = vmul.f32 0.2, %v266_v36 }
 0x114   :  { %v302_v38 = vsel %vm278_vm2, %v266_v36, %v290_v37 }
 0x115   :  { %v339_v39 = vsel %vm310_vm1, %v302_v38, -inf }
 0x116   :  { %v340_v40 = vrot.slane %v339_v39, 4 }
 0x117   :  { %v227_v43 = vpop.permute.xlu1 %226  ;;  %v237_v44 = vpop.permute.xlu2 %236 }
 0x118   :  { %v341_v45 = vmax.f32 %v339_v39, %v340_v40  ;;  %v262_v46 = vadd.f32 %v227_v43, %v187_v41  ;;  %v267_v47 = vadd.f32 %v237_v44, %v192_v42 }
 0x119   :  { %v229_v48 = vpop.permute.xlu0 %228 }
 0x11a   :  { %v342_v50 = vrot.slane %v341_v45, 2  ;;  %vm274_vm3 = vcmp.gt.f32.partialorder %v262_v46, 0.0  ;;  %v286_v51 = vmul.f32 0.2, %v262_v46  ;;  %vm279_vm4 = vcmp.gt.f32.partialorder %v267_v47, 0.0 }
 0x11b   :  { %v291_v52 = vmul.f32 0.2, %v267_v47  ;;  %v263_v53 = vadd.f32 %v229_v48, %v188_v49 }
 0x11c   :  { %v343_v54 = vmax.f32 %v341_v45, %v342_v50  ;;  %v2403_v55 = vsel %vm274_vm3, %v262_v46, %v286_v51 }
 0x11d   :  { %v311_v56 = vsel %vm310_vm1, %v2403_v55, -inf  ;;  %v2407_v57 = vsel %vm279_vm4, %v267_v47, %v291_v52  ;;  %vm275_vm5 = vcmp.gt.f32.partialorder %v263_v53, 0.0  ;;  %v287_v58 = vmul.f32 0.2, %v263_v53 }
 0x11e   :  { %v344_v59 = vrot.slane %v343_v54, 1  ;;  %v312_v60 = vrot.slane %v311_v56, 4  ;;  %v346_v61 = vsel %vm310_vm1, %v2407_v57, -inf  ;;  %v197_v52 = vperm.slane %v2387_v28, 0 }
 0x11f   :  { %v347_v62 = vrot.slane %v346_v61, 4  ;;  %v2411_v63 = vsel %vm275_vm5, %v263_v53, %v287_v58  ;;  %vm1044_vm4 = vcmask 1041409   ;;  %vm1047_vm5 = vcmask 1042434  }
 0x120   :  { %v345_v2 = vmax.f32 %v343_v54, %v344_v59  ;;  %v313_v3 = vmax.f32 %v311_v56, %v312_v60  ;;  %v318_v4 = vsel %vm310_vm1, %v2411_v63, -inf  ;;  %v198_v59 = vperm.slane %v2390_v29, 0 }
 0x121   :  { %v348_v6 = vmax.f32 %v346_v61, %v347_v62  ;;  %v319_v7 = vrot.slane %v318_v4, 4  ;;  %v231_v8 = vpop.permute.xlu0 %230  ;;  %v233_v9 = vpop.permute.xlu1 %232 }
 0x122   :  { %v399_v18 = vsub.f32 %v302_v38, %v345_v2  ;;  %v314_v19 = vrot.slane %v313_v3, 2  ;;  %v264_v20 = vadd.f32 %v231_v8, %v189_v0  ;;  %v265_v23 = vadd.f32 %v233_v9, %v190_v1  ;;  %v245_v24 = vpop.permute.xlu2 %244 }
 0x123   :  { %v349_v27 = vrot.slane %v348_v6, 2  ;;  %v320_v30 = vmax.f32 %v318_v4, %v319_v7  ;;  %v271_v31 = vadd.f32 %v245_v24, %v196_v12 }
 0x124   :  { %v415_v33 = vmul.f32 1.442695, %v399_v18  ;;  %v315_v34 = vmax.f32 %v313_v3, %v314_v19  ;;  %vm276_vm6 = vcmp.gt.f32.partialorder %v264_v20, 0.0  ;;  %v288_v35 = vmul.f32 0.2, %v264_v20 }
 0x125   :  { %v350_v36 = vmax.f32 %v348_v6, %v349_v27  ;;  %v321_v37 = vrot.slane %v320_v30, 2  ;;  %vm277_vm7 = vcmp.gt.f32.partialorder %v265_v23, 0.0  ;;  %v289_v39 = vmul.f32 0.2, %v265_v23 }
 0x126   :  { %1977 = vpow2.f32 %v415_v33  ;;  %v316_v40 = vrot.slane %v315_v34, 1  ;;  %v2421_v38 = vsel %vm276_vm6, %v264_v20, %v288_v35  ;;  %vm283_vm8 = vcmp.gt.f32.partialorder %v271_v31, 0.0 }
 0x127   :  { %v351_v41 = vrot.slane %v350_v36, 1  ;;  %v322_v42 = vmax.f32 %v320_v30, %v321_v37  ;;  %v325_v43 = vsel %vm310_vm1, %v2421_v38, -inf  ;;  %v2425_v44 = vsel %vm277_vm7, %v265_v23, %v289_v39 }
 0x128   :  { %v317_v45 = vmax.f32 %v315_v34, %v316_v40  ;;  %v326_v46 = vrot.slane %v325_v43, 4  ;;  %v332_v47 = vsel %vm310_vm1, %v2425_v44, -inf  ;;  %v295_v48 = vmul.f32 0.2, %v271_v31 }
 0x129   :  { %v352_v49 = vmax.f32 %v350_v36, %v351_v41  ;;  %v323_v50 = vrot.slane %v322_v42, 1  ;;  %v333_v51 = vrot.slane %v332_v47, 4  ;;  %v2277_v40 = vmov 32  }
 0x12a   :  { %v395_v53 = vsub.f32 %v2403_v55, %v317_v45  ;;  %v327_v54 = vmax.f32 %v325_v43, %v326_v46  ;;  %v2431_v56 = vsel %vm283_vm8, %v271_v31, %v295_v48  ;;  %v249_v58 = vpop.permute.xlu2 %248  ;;  %1969 = vset.pattern.permute.xlu2 %v2277_v40  ;;  %1970 = vset.pattern.permute.xlu0 %v2277_v40  ;;  %vm1050_vm7 = vcmask 1043459  }
 0x12b   :  { %v400_v60 = vsub.f32 %v2407_v57, %v352_v49  ;;  %v324_v61 = vmax.f32 %v322_v42, %v323_v50  ;;  %v334_v62 = vmax.f32 %v332_v47, %v333_v51  ;;  %v374_v0 = vsel %vm310_vm1, %v2431_v56, -inf  ;;  %1971 = vset.pattern.permute.xlu1 %v2277_v40 }
 0x12c   :  { %v2437_v1 = vpop.eup %1977  ;;  %v407_v2 = vmul.f32 1.442695, %v395_v53  ;;  %v328_v3 = vrot.slane %v327_v54, 2  ;;  %v375_v4 = vrot.slane %v374_v0, 4  ;;  %v273_v6 = vadd.f32 %v249_v58, %v198_v59 }
 0x12d   :  { %v459_v55 = vsel %vm310_vm1, %v2437_v1, 0.0  ;;  %v417_v7 = vmul.f32 1.442695, %v400_v60  ;;  %v396_v8 = vsub.f32 %v2411_v63, %v324_v61  ;;  %v335_v9 = vrot.slane %v334_v62, 2 }
 0x12e   :  { %v460_v12 = vrot.slane %v459_v55, 4  ;;  %1979 = vpow2.f32 %v407_v2  ;;  %v329_v57 = vmax.f32 %v327_v54, %v328_v3  ;;  %v376_v18 = vmax.f32 %v374_v0, %v375_v4 }
 0x12f   :  { %1981 = vpow2.f32 %v417_v7  ;;  %v409_v19 = vmul.f32 1.442695, %v396_v8  ;;  %v336_v20 = vmax.f32 %v334_v62, %v335_v9  ;;  %vm285_vm9 = vcmp.gt.f32.partialorder %v273_v6, 0.0  ;;  %v239_v23 = vpop.permute.xlu0 %238 }
 0x130   :  { %v2442_v24 = vadd.f32 %v460_v12, %v459_v55  ;;  %v330_v27 = vrot.slane %v329_v57, 1  ;;  %v377_v30 = vrot.slane %v376_v18, 2  ;;  %v297_v31 = vmul.f32 0.2, %v273_v6 }
 0x131   :  { %1983 = vpow2.f32 %v409_v19  ;;  %v337_v33 = vrot.slane %v336_v20, 1  ;;  %v268_v63 = vadd.f32 %v239_v23, %v193_v5  ;;  %v241_v34 = vpop.permute.xlu1 %240 }
 0x132   :  { %v331_v35 = vmax.f32 %v329_v57, %v330_v27  ;;  %v378_v36 = vmax.f32 %v376_v18, %v377_v30  ;;  %v2446_v37 = vsel %vm285_vm9, %v273_v6, %v297_v31  ;;  %v269_v39 = vadd.f32 %v241_v34, %v194_v15 }
 0x133   :  { %v338_v41 = vmax.f32 %v336_v20, %v337_v33  ;;  %v388_v42 = vsel %vm310_vm1, %v2446_v37, -inf  ;;  %vm280_vm10 = vcmp.gt.f32.partialorder %v268_v63, 0.0  ;;  %v292_v43 = vmul.f32 0.2, %v268_v63 }
 0x134   :  { %v2452_v45 = vpop.eup %1979  ;;  %v397_v5 = vsub.f32 %v2421_v38, %v331_v35  ;;  %v379_v46 = vrot.slane %v378_v36, 1  ;;  %v389_v47 = vrot.slane %v388_v42, 4  ;;  %vm281_vm11 = vcmp.gt.f32.partialorder %v269_v39, 0.0 }
 0x135   :  { %v2455_v48 = vpop.eup %1981  ;;  %v431_v15 = vsel %vm310_vm1, %v2452_v45, 0.0  ;;  %v398_v49 = vsub.f32 %v2425_v44, %v338_v41  ;;  %v2460_v50 = vsel %vm280_vm10, %v268_v63, %v292_v43  ;;  %v293_v51 = vmul.f32 0.2, %v269_v39 }
 0x136   :  { %v432_v53 = vrot.slane %v431_v15, 4  ;;  %v466_v54 = vsel %vm310_vm1, %v2455_v48, 0.0  ;;  %v411_v58 = vmul.f32 1.442695, %v397_v5  ;;  %v380_v59 = vmax.f32 %v378_v36, %v379_v46 }
 0x137   :  { %v2464_v38 = vpop.eup %1983  ;;  %v467_v60 = vrot.slane %v466_v54, 4  ;;  %v413_v61 = vmul.f32 1.442695, %v398_v49  ;;  %v390_v62 = vmax.f32 %v388_v42, %v389_v47  ;;  %v353_v0 = vsel %vm310_vm1, %v2460_v50, -inf }
 0x138   :  { %v433_v2 = vadd.f32 %v432_v53, %v431_v15  ;;  %v438_v44 = vsel %vm310_vm1, %v2464_v38, 0.0  ;;  %1985 = vpow2.f32 %v411_v58  ;;  %v404_v3 = vsub.f32 %v2431_v56, %v380_v59 }
 0x139   :  { %v2471_v4 = vadd.f32 %v467_v60, %v466_v54  ;;  %v439_v6 = vrot.slane %v438_v44, 4  ;;  %1987 = vpow2.f32 %v413_v61  ;;  %v391_v55 = vrot.slane %v390_v62, 2  ;;  %v243_v7 = vpop.permute.xlu1 %242 }
 0x13a   :  { %v425_v8 = vmul.f32 1.442695, %v404_v3  ;;  %v354_v9 = vrot.slane %v353_v0, 4  ;;  %v2474_v12 = vsel %vm281_vm11, %v269_v39, %v293_v51  ;;  %v270_v57 = vadd.f32 %v243_v7, %v195_v32 }
 0x13b   :  { %v440_v18 = vadd.f32 %v439_v6, %v438_v44  ;;  %v392_v19 = vmax.f32 %v390_v62, %v391_v55  ;;  %v360_v20 = vsel %vm310_vm1, %v2474_v12, -inf  ;;  %v434_v56 = vrot.slane %v433_v2, 2 }
 0x13c   :  { %1989 = vpow2.f32 %v425_v8  ;;  %v355_v23 = vmax.f32 %v353_v0, %v354_v9  ;;  %v361_v27 = vrot.slane %v360_v20, 4  ;;  %vm282_vm12 = vcmp.gt.f32.partialorder %v270_v57, 0.0 }
 0x13d   :  { %v393_v30 = vrot.slane %v392_v19, 1  ;;  %v294_v31 = vmul.f32 0.2, %v270_v57  ;;  %v435_v33 = vadd.f32 %v434_v56, %v433_v2  ;;  %v441_v63 = vrot.slane %v440_v18, 2 }
 0x13e   :  { %v2480_v34 = vpop.eup %1985  ;;  %v356_v35 = vrot.slane %v355_v23, 2  ;;  %v362_v36 = vmax.f32 %v360_v20, %v361_v27  ;;  %v462_v32 = vrot.slane %v2442_v24, 2  ;;  %v469_v39 = vrot.slane %v2471_v4, 2 }
 0x13f   :  { %v2484_v40 = vpop.eup %1987  ;;  %v445_v41 = vsel %vm310_vm1, %v2480_v34, 0.0  ;;  %v394_v42 = vmax.f32 %v392_v19, %v393_v30  ;;  %v2488_v43 = vsel %vm282_vm12, %v270_v57, %v294_v31  ;;  %v247_v5 = vpop.permute.xlu0 %246  ;;  %v436_v46 = vrot.slane %v435_v33, 1 }
 0x140   :  { %v446_v47 = vrot.slane %v445_v41, 4  ;;  %v452_v15 = vsel %vm310_vm1, %v2484_v40, 0.0  ;;  %v357_v49 = vmax.f32 %v355_v23, %v356_v35  ;;  %v363_v51 = vrot.slane %v362_v36, 2 }
 0x141   :  { %v453_v53 = vrot.slane %v452_v15, 4  ;;  %v406_v54 = vsub.f32 %v2446_v37, %v394_v42  ;;  %v367_v58 = vsel %vm310_vm1, %v2488_v43, -inf  ;;  %v272_v59 = vadd.f32 %v247_v5, %v197_v52 }
 0x142   :  { %v2497_v60 = vpop.eup %1989  ;;  %v447_v61 = vadd.f32 %v446_v47, %v445_v41  ;;  %v358_v62 = vrot.slane %v357_v49, 1  ;;  %v364_v0 = vmax.f32 %v362_v36, %v363_v51  ;;  %v368_v2 = vrot.slane %v367_v58, 4 }
 0x143   :  { %v454_v44 = vadd.f32 %v453_v53, %v452_v15  ;;  %v494_v3 = vsel %vm310_vm1, %v2497_v60, 0.0  ;;  %v429_v6 = vmul.f32 1.442695, %v406_v54  ;;  %vm284_vm13 = vcmp.gt.f32.partialorder %v272_v59, 0.0 }
 0x144   :  { %v495_v55 = vrot.slane %v494_v3, 4  ;;  %v359_v37 = vmax.f32 %v357_v49, %v358_v62  ;;  %v365_v7 = vrot.slane %v364_v0, 1  ;;  %v369_v8 = vmax.f32 %v367_v58, %v368_v2 }
 0x145   :  { %1991 = vpow2.f32 %v429_v6  ;;  %v296_v9 = vmul.f32 0.2, %v272_v59  ;;  %v437_v57 = vadd.f32 %v436_v46, %v435_v33  ;;  %v442_v52 = vadd.f32 %v441_v63, %v440_v18 }
 0x146   :  { %v496_v19 = vadd.f32 %v495_v55, %v494_v3  ;;  %v401_v20 = vsub.f32 %v2460_v50, %v359_v37  ;;  %v366_v56 = vmax.f32 %v364_v0, %v365_v7  ;;  %v370_v23 = vrot.slane %v369_v8, 2 }
 0x147   :  { %v2502_v27 = vsel %vm284_vm13, %v272_v59, %v296_v9  ;;  %1993 = vrcp.f32 %v437_v57  ;;  %v443_v30 = vrot.slane %v442_v52, 1  ;;  %v463_v31 = vadd.f32 %v462_v32, %v2442_v24 }
 0x148   :  { %v419_v35 = vmul.f32 1.442695, %v401_v20  ;;  %v402_v36 = vsub.f32 %v2474_v12, %v366_v56  ;;  %v371_v41 = vmax.f32 %v369_v8, %v370_v23  ;;  %v381_v42 = vsel %vm310_vm1, %v2502_v27, -inf }
 0x149   :  { %v382_v33 = vrot.slane %v381_v42, 4  ;;  %v444_v18 = vadd.f32 %v443_v30, %v442_v52  ;;  %v464_v63 = vrot.slane %v463_v31, 1  ;;  %v448_v5 = vrot.slane %v447_v61, 2 }
 0x14a   :  { %1995 = vpow2.f32 %v419_v35  ;;  %v421_v50 = vmul.f32 1.442695, %v402_v36  ;;  %v372_v46 = vrot.slane %v371_v41, 1  ;;  %v470_v47 = vadd.f32 %v469_v39, %v2471_v4 }
 0x14b   :  { %v2509_v15 = vpop.eup %1991  ;;  %v383_v49 = vmax.f32 %v381_v42, %v382_v33  ;;  %1997 = vrcp.f32 %v444_v18  ;;  %v465_v24 = vadd.f32 %v464_v63, %v463_v31  ;;  %v449_v32 = vadd.f32 %v448_v5, %v447_v61 }
 0x14c   :  { %v508_v12 = vsel %vm310_vm1, %v2509_v15, 0.0  ;;  %1999 = vpow2.f32 %v421_v50  ;;  %v373_v51 = vmax.f32 %v371_v41, %v372_v46  ;;  %v471_v53 = vrot.slane %v470_v47, 1 }
 0x14d   :  { %v1994_v54 = vpop.eup %1993  ;;  %v509_v58 = vrot.slane %v508_v12, 4  ;;  %v384_v59 = vrot.slane %v383_v49, 2  ;;  %2001 = vrcp.f32 %v465_v24  ;;  %v450_v62 = vrot.slane %v449_v32, 1 }
 0x14e   :  { %v403_v0 = vsub.f32 %v2488_v43, %v373_v51  ;;  %v527_v4 = vmul.f32 %v1994_v54, %v2452_v45  ;;  %v472_v39 = vadd.f32 %v471_v53, %v470_v47  ;;  %v455_v2 = vrot.slane %v454_v44, 2 }
 0x14f   :  { %v510_v3 = vadd.f32 %v509_v58, %v508_v12  ;;  %v385_v6 = vmax.f32 %v383_v49, %v384_v59  ;;  %v451_v61 = vadd.f32 %v450_v62, %v449_v32  ;;  %v497_v55 = vrot.slane %v496_v19, 2 }
 0x150   :  { %v2515_v37 = vpop.eup %1995  ;;  %v423_v7 = vmul.f32 1.442695, %v403_v0  ;;  %541 = vperm.xlu2 %1969, %v527_v4   ;;  %2003 = vrcp.f32 %v472_v39  ;;  %v456_v8 = vadd.f32 %v455_v2, %v454_v44  ;;  %vm1053_vm9 = vcmask 1044484  }
 0x151   :  { %v1998_v9 = vpop.eup %1997  ;;  %v473_v57 = vsel %vm310_vm1, %v2515_v37, 0.0  ;;  %v386_v52 = vrot.slane %v385_v6, 1  ;;  %2005 = vrcp.f32 %v451_v61  ;;  %v498_v43 = vadd.f32 %v497_v55, %v496_v19 }
 0x152   :  { %v2519_v45 = vpop.eup %1999  ;;  %v474_v20 = vrot.slane %v473_v57, 4  ;;  %2007 = vpow2.f32 %v423_v7  ;;  %v528_v56 = vmul.f32 %v1998_v9, %v2464_v38  ;;  %v457_v23 = vrot.slane %v456_v8, 1 }
 0x153   :  { %v2002_v30 = vpop.eup %2001  ;;  %v480_v31 = vsel %vm310_vm1, %v2519_v45, 0.0  ;;  %v387_v35 = vmax.f32 %v385_v6, %v386_v52  ;;  %v499_v44 = vrot.slane %v498_v43, 1  ;;  %v511_v36 = vrot.slane %v510_v3, 2 }
 0x154   :  { %v475_v41 = vadd.f32 %v474_v20, %v473_v57  ;;  %v481_v42 = vrot.slane %v480_v31, 4  ;;  %546 = vperm.xlu0 %1970, %v528_v56   ;;  %v458_v33 = vadd.f32 %v457_v23, %v456_v8  ;;  %v531_v38 = vmul.f32 %v2002_v30, %v2437_v1 }
 0x155   :  { %v405_v19 = vsub.f32 %v2502_v27, %v387_v35  ;;  %v500_v18 = vadd.f32 %v499_v44, %v498_v43  ;;  %v512_v63 = vadd.f32 %v511_v36, %v510_v3  ;;  %vm1056_vm12 = vcmask 1045509  }
 0x156   :  { %v2004_v5 = vpop.eup %2003  ;;  %v482_v50 = vadd.f32 %v481_v42, %v480_v31  ;;  %v476_v46 = vrot.slane %v475_v41, 2  ;;  %2009 = vrcp.f32 %v458_v33  ;;  %vm1059_vm13 = vcmask 1046534  }
 0x157   :  { %v2006_v47 = vpop.eup %2005  ;;  %v427_v49 = vmul.f32 1.442695, %v405_v19  ;;  %2011 = vrcp.f32 %v500_v18  ;;  %v513_v27 = vrot.slane %v512_v63, 1  ;;  %v532_v58 = vmul.f32 %v2004_v5, %v2455_v48 }
 0x158   :  { %v2008_v24 = vpop.eup %2007  ;;  %561 = vperm.xlu2 %1969, %v531_v38   ;;  %v529_v32 = vmul.f32 %v2006_v47, %v2480_v34  ;;  %v477_v12 = vadd.f32 %v476_v46, %v475_v41  ;;  %v483_v51 = vrot.slane %v482_v50, 2  ;;  %v1887_v18 = vrot.slane %v2344_v10, 9 }
 0x159   :  { %v487_v53 = vsel %vm310_vm1, %v2008_v24, 0.0  ;;  %2013 = vpow2.f32 %v427_v49  ;;  %v514_v2 = vadd.f32 %v513_v27, %v512_v63  ;;  %v1890_v38 = vrot.slane %v2354_v14, 9 }
 0x15a   :  { %v488_v54 = vrot.slane %v487_v53, 4  ;;  %551 = vperm.xlu1 %1971, %v529_v32   ;;  %v478_v1 = vrot.slane %v477_v12, 1  ;;  %v484_v59 = vadd.f32 %v483_v51, %v482_v50  ;;  %v695_v63 = vadd.f32 %v1887_v18, %v2344_v10 }
 0x15b   :  { %v1900_v46 = vrot.slane %v2347_v11, 10  ;;  %v1901_v49 = vrot.slane %v2351_v13, 10  ;;  %v1911_v32 = vrot.slane %v2344_v10, 11 }
 0x15c   :  { %v489_v62 = vadd.f32 %v488_v54, %v487_v53  ;;  %566 = vperm.xlu0 %1970, %v532_v58   ;;  %v479_v0 = vadd.f32 %v478_v1, %v477_v12  ;;  %v485_v4 = vrot.slane %v484_v59, 1  ;;  %v2010_v39 = vpop.eup %2009  ;;  %v698_v12 = vadd.f32 %v1890_v38, %v2354_v14 }
 0x15d   :  { %v2012_v34 = vpop.eup %2011  ;;  %v530_v7 = vmul.f32 %v2010_v39, %v2484_v40  ;;  %v1912_v53 = vrot.slane %v2347_v11, 11  ;;  %v1913_v54 = vrot.slane %v2351_v13, 11  ;;  %v1902_v58 = vrot.slane %v2354_v14, 10 }
 0x15e   :  { %v486_v3 = vadd.f32 %v485_v4, %v484_v59  ;;  %v490_v6 = vrot.slane %v489_v62, 2  ;;  %2015 = vrcp.f32 %v479_v0  ;;  %v536_v9 = vmul.f32 %v2012_v34, %v2497_v60 }
 0x15f   :  { %v2014_v61 = vpop.eup %2013  ;;  %v782_v59 = vadd.f32 %v1902_v58, %v698_v12  ;;  %v1914_v4 = vrot.slane %v2354_v14, 11  ;;  %v1906_v12 = vrot.slane %v2372_v22, 10 }
 0x160   :  { %v501_v55 = vsel %vm310_vm1, %v2014_v61, 0.0  ;;  %2017 = vrcp.f32 %v486_v3  ;;  %v491_v8 = vadd.f32 %v490_v6, %v489_v62 }
 0x161   :  { %v502_v48 = vrot.slane %v501_v55, 4  ;;  %2019 = vrcp.f32 %v514_v2  ;;  %v1891_v2 = vrot.slane %v2360_v16, 9  ;;  %v866_v34 = vadd.f32 %v1914_v4, %v782_v59 }
 0x162   :  { %556 = vperm.xlu1 %1971, %v530_v7   ;;  %v492_v57 = vrot.slane %v491_v8, 1 }
 0x163   :  { %v503_v52 = vadd.f32 %v502_v48, %v501_v55  ;;  %v699_v55 = vadd.f32 %v1891_v2, %v2360_v16  ;;  %v2558_v7 = vmul.f32 0.25, %v866_v34  ;;  %v1903_v48 = vrot.slane %v2360_v16, 10 }
 0x164   :  { %586 = vperm.xlu0 %1970, %v536_v9   ;;  %v493_v43 = vadd.f32 %v492_v57, %v491_v8  ;;  %v2016_v20 = vpop.eup %2015  ;;  %v1893_v57 = vrot.slane %v2369_v21, 9 }
 0x165   :  { %v504_v56 = vrot.slane %v503_v52, 2  ;;  %v533_v40 = vmul.f32 %v2016_v20, %v2515_v37  ;;  %v1889_v37 = vrot.slane %v2351_v13, 9  ;;  %v974_v20 = vmin.f32 %v2558_v7, 0.0 }
 0x166   :  { %v2018_v23 = vpop.eup %2017  ;;  %2021 = vrcp.f32 %v493_v43  ;;  %v783_v43 = vadd.f32 %v1903_v48, %v699_v55  ;;  %v1918_v48 = vrot.slane %v2372_v22, 11  ;;  %vm962_vm2 = vcmp.gt.f32.partialorder %v2558_v7, 0.0 }
 0x167   :  { %v2020_v30 = vpop.eup %2019  ;;  %v534_v31 = vmul.f32 %v2018_v23, %v2519_v45  ;;  %v505_v35 = vadd.f32 %v504_v56, %v503_v52  ;;  %v1888_v45 = vrot.slane %v2347_v11, 9  ;;  %v697_v50 = vadd.f32 %v1889_v37, %v2351_v13 }
 0x168   :  { %v538_v36 = vmul.f32 %v2020_v30, %v2509_v15  ;;  %v1899_v15 = vrot.slane %v2344_v10, 10  ;;  %v1892_v23 = vrot.slane %v2363_v17, 9  ;;  %v1915_v30 = vrot.slane %v2360_v16, 11 }
 0x169   :  { %576 = vperm.xlu2 %1969, %v534_v31   ;;  %v506_v44 = vrot.slane %v505_v35, 1  ;;  %v696_v5 = vadd.f32 %v1888_v45, %v2347_v11  ;;  %v781_v51 = vadd.f32 %v1901_v49, %v697_v50  ;;  %v701_v31 = vadd.f32 %v1893_v57, %v2369_v21 }
 0x16a   :  { %571 = vperm.xlu1 %1971, %v533_v40   ;;  %v779_v47 = vadd.f32 %v1899_v15, %v695_v63  ;;  %v867_v40 = vadd.f32 %v1915_v30, %v783_v43  ;;  %v1917_v37 = vrot.slane %v2369_v21, 11  ;;  %v1895_v63 = vrot.slane %v2377_v25, 9 }
 0x16b   :  { %v507_v60 = vadd.f32 %v506_v44, %v505_v35  ;;  %v865_v62 = vadd.f32 %v1913_v54, %v781_v51  ;;  %v1905_v44 = vrot.slane %v2369_v21, 10 }
 0x16c   :  { %v2022_v41 = vpop.eup %2021  ;;  %596 = vperm.xlu0 %1970, %v538_v36   ;;  %v863_v27 = vadd.f32 %v1911_v32, %v779_v47  ;;  %v989_v36 = vmul.f32 1.442695, %v974_v20  ;;  %v2571_v18 = vmul.f32 0.25, %v867_v40  ;;  %v1916_v47 = vrot.slane %v2363_v17, 11 }
 0x16d   :  { %v535_v42 = vmul.f32 %v2022_v41, %v2008_v24  ;;  %2023 = vrcp.f32 %v507_v60  ;;  %v780_v24 = vadd.f32 %v1900_v46, %v696_v5  ;;  %v2554_v3 = vmul.f32 0.25, %v865_v62 }
 0x16e   :  { %v2550_v0 = vmul.f32 0.25, %v863_v27  ;;  %v700_v60 = vadd.f32 %v1892_v23, %v2363_v17  ;;  %v1894_v41 = vrot.slane %v2372_v22, 9  ;;  %v1896_v46 = vrot.slane %v2380_v26, 9 }
 0x16f   :  { %v864_v1 = vadd.f32 %v1912_v53, %v780_v24  ;;  %v973_v8 = vmin.f32 %v2554_v3, 0.0  ;;  %v975_v49 = vmin.f32 %v2571_v18, 0.0  ;;  %v703_v51 = vadd.f32 %v1895_v63, %v2377_v25 }
 0x170   :  { %v971_v6 = vmin.f32 %v2550_v0, 0.0  ;;  %v702_v15 = vadd.f32 %v1894_v41, %v2372_v22  ;;  %vm959_vm14 = vcmp.gt.f32.partialorder %v2550_v0, 0.0  ;;  %v1907_v62 = vrot.slane %v2377_v25, 10 }
 0x171   :  { %581 = vperm.xlu2 %1969, %v535_v42   ;;  %v948_v39 = vmul.f32 0.25, %v864_v1  ;;  %v987_v56 = vmul.f32 1.442695, %v973_v8  ;;  %v785_v42 = vadd.f32 %v1905_v44, %v701_v31  ;;  %v704_v2 = vadd.f32 %v1896_v46, %v2380_v26 }
 0x172   :  { %v983_v9 = vmul.f32 1.442695, %v971_v6  ;;  %v786_v58 = vadd.f32 %v1906_v12, %v702_v15  ;;  %v991_v34 = vmul.f32 1.442695, %v975_v49  ;;  %vm961_vm1 = vcmp.gt.f32.partialorder %v2554_v3, 0.0 }
 0x173   :  { %v2024_v33 = vpop.eup %2023  ;;  %v869_v38 = vadd.f32 %v1917_v37, %v785_v42  ;;  %vm960_vm15 = vcmp.gt.f32.partialorder %v948_v39, 0.0  ;;  %v787_v55 = vadd.f32 %v1907_v62, %v703_v51  ;;  %v1908_v8 = vrot.slane %v2380_v26, 10 }
 0x174   :  { %v537_v19 = vmul.f32 %v2024_v33, %v2014_v61  ;;  %v972_v61 = vmin.f32 %v948_v39, 0.0  ;;  %2025 = vpow2.f32 %v983_v9  ;;  %v1904_v33 = vrot.slane %v2363_v17, 10 }
 0x175   :  { %v2582_v59 = vmul.f32 0.25, %v869_v38  ;;  %v788_v20 = vadd.f32 %v1908_v8, %v704_v2  ;;  %v1920_v40 = vrot.slane %v2380_v26, 11  ;;  %v1909_v63 = vrot.slane %v2387_v28, 10 }
 0x176   :  { %591 = vperm.xlu1 %1971, %v537_v19   ;;  %v985_v52 = vmul.f32 1.442695, %v972_v61  ;;  %v784_v5 = vadd.f32 %v1904_v33, %v700_v60  ;;  %v1898_v38 = vrot.slane %v2390_v29, 9  ;;  %v1910_v12 = vrot.slane %v2390_v29, 10 }
 0x178   :  { %2027 = vpow2.f32 %v985_v52  ;;  %v868_v27 = vadd.f32 %v1916_v47, %v784_v5  ;;  %v1921_v5 = vrot.slane %v2387_v28, 11 }
 0x179   :  { %2029 = vpow2.f32 %v987_v56  ;;  %v870_v56 = vadd.f32 %v1918_v48, %v786_v58  ;;  %v706_v48 = vadd.f32 %v1898_v38, %v2390_v29 }
 0x17a   :  { %v2026_v19 = vpop.eup %2025  ;;  %2031 = vpow2.f32 %v989_v36  ;;  %v2597_v9 = vmul.f32 0.25, %v868_v27  ;;  %v1922_v27 = vrot.slane %v2390_v29, 11 }
 0x17b   :  { %v1935_v24 = vadd.f32 -1.0, %v2026_v19  ;;  %2033 = vpow2.f32 %v991_v34  ;;  %v872_v19 = vadd.f32 %v1920_v40, %v788_v20 }
 0x17c   :  { %v976_v42 = vmin.f32 %v2597_v9, 0.0 }
 0x17d   :  { %v2591_v6 = vsel %vm959_vm14, %v2550_v0, %v1935_v24  ;;  %v977_v0 = vmin.f32 %v2582_v59, 0.0  ;;  %vm1062_vm14 = vcmask 1047559  }
 0x17e   :  { %v2028_v45 = vpop.eup %2027  ;;  %v1083_v23 = vperm.slane %v2591_v6, 0 }
 0x17f   :  { %v2030_v50 = vpop.eup %2029  ;;  %v1936_v32 = vadd.f32 -1.0, %v2028_v45  ;;  %v2621_v45 = vmul.f32 0.25, %v870_v56  ;;  %v995_v37 = vmul.f32 1.442695, %v977_v0 }
 0x180   :  { %v1937_v54 = vadd.f32 -1.0, %v2030_v50  ;;  %v2032_v1 = vpop.eup %2031 }
 0x181   :  { %v2593_v61 = vsel %vm960_vm15, %v948_v39, %v1936_v32  ;;  %v1938_v52 = vadd.f32 -1.0, %v2032_v1  ;;  %v2633_v47 = vpop.eup %2033  ;;  %2035 = vpow2.f32 %v995_v37 }
 0x182   :  { %v2604_v43 = vsel %vm961_vm1, %v2554_v3, %v1937_v54  ;;  %v1084_v30 = vperm.slane %v2593_v61, 0  ;;  %v2639_v54 = vmul.f32 0.25, %v872_v19  ;;  %vm963_vm1 = vcmp.gt.f32.partialorder %v2571_v18, 0.0 }
 0x183   :  { %v1085_v3 = vperm.slane %v2604_v43, 0  ;;  %v2617_v41 = vsel %vm962_vm2, %v2558_v7, %v1938_v52 }
 0x1aa   :  { %v542_v35 = vpop.permute.xlu2 %541 }
 0x1ab   :  { %v2586_v4 = vmul.f32 %v542_v35, %v2344_v10  ;;  %v1919_v10 = vrot.slane %v2377_v25, 11 }
 0x1ad   :  { %v623_v39 = vrot.slane %v2586_v4, 1  ;;  %v871_v44 = vadd.f32 %v1919_v10, %v787_v55  ;;  %v707_v7 = vrot.slane %v2586_v4, 2  ;;  %v791_v55 = vrot.slane %v2586_v4, 3 }
 0x1ae   :  { %v978_v10 = vmin.f32 %v2621_v45, 0.0 }
 0x1af   :  { %v647_v33 = vadd.f32 %v623_v39, %v2586_v4  ;;  %v2631_v46 = vmul.f32 0.25, %v871_v44 }
 0x1b1   :  { %v731_v51 = vadd.f32 %v707_v7, %v647_v33  ;;  %v979_v20 = vmin.f32 %v2631_v46, 0.0  ;;  %v790_v33 = vadd.f32 %v1910_v12, %v706_v48  ;;  %v1110_v48 = vld [vmem:[#allocation8 + $0x10] sm:$0xff] }
 0x1b2   :  { %v562_v53 = vpop.permute.xlu2 %561 }
 0x1b3   :  { %v2601_v57 = vmul.f32 %v562_v53, %v2360_v16  ;;  %v1897_v16 = vrot.slane %v2387_v28, 9  ;;  %v2649_v56 = vadd.f32 %v791_v55, %v731_v51 }
 0x1b5   :  { %v627_v36 = vrot.slane %v2601_v57, 1  ;;  %v795_v4 = vrot.slane %v2601_v57, 3  ;;  %vm875_vm8 = vcmp.gt.f32.partialorder %v2649_v56, 0.0 }
 0x1b7   :  { %v651_v49 = vadd.f32 %v627_v36, %v2601_v57 }
 0x1c3   :  { %v577_v35 = vpop.permute.xlu2 %576 }
 0x1c4   :  { %v2626_v50 = vmul.f32 %v577_v35, %v2372_v22  ;;  %v711_v22 = vrot.slane %v2601_v57, 2  ;;  %v997_v57 = vmul.f32 1.442695, %v978_v10 }
 0x1c6   :  { %v547_v31 = vpop.permute.xlu0 %546  ;;  %v630_v62 = vrot.slane %v2626_v50, 1  ;;  %v735_v52 = vadd.f32 %v711_v22, %v651_v49  ;;  %v2659_v49 = vmul.f32 1.442695, %v979_v20 }
 0x1c7   :  { %v600_v60 = vmul.f32 %v547_v31, %v2347_v11  ;;  %v705_v11 = vadd.f32 %v1897_v16, %v2387_v28  ;;  %v993_v31 = vmul.f32 1.442695, %v976_v42 }
 0x1c8   :  { %v654_v35 = vadd.f32 %v630_v62, %v2626_v50  ;;  %v2656_v19 = vadd.f32 %v795_v4, %v735_v52  ;;  %v2672_v52 = vpop.eup %2035 }
 0x1c9   :  { %v624_v15 = vrot.slane %v600_v60, 1  ;;  %v708_v32 = vrot.slane %v600_v60, 2  ;;  %v792_v1 = vrot.slane %v600_v60, 3  ;;  %v789_v34 = vadd.f32 %v1909_v63, %v705_v11 }
 0x1ca   :  { %v714_v63 = vrot.slane %v2626_v50, 2  ;;  %v891_v62 = vmin.f32 %v2656_v19, 0.0  ;;  %2037 = vpow2.f32 %v993_v31  ;;  %vm879_vm11 = vcmp.gt.f32.partialorder %v2656_v19, 0.0 }
 0x1cb   :  { %v648_v24 = vadd.f32 %v624_v15, %v600_v60  ;;  %v582_v11 = vpop.permute.xlu2 %581  ;;  %v873_v10 = vadd.f32 %v1921_v5, %v789_v34 }
 0x1cc   :  { %v552_v53 = vpop.permute.xlu1 %551 }
 0x1cd   :  { %v732_v58 = vadd.f32 %v708_v32, %v648_v24  ;;  %v601_v2 = vmul.f32 %v552_v53, %v2351_v13  ;;  %v980_v13 = vmin.f32 %v2639_v54, 0.0  ;;  %v887_v24 = vmin.f32 %v2649_v56, 0.0 }
 0x1ce   :  { %v567_v8 = vpop.permute.xlu0 %566  ;;  %v738_v32 = vadd.f32 %v714_v63, %v654_v35  ;;  %v1108_v63 = vld [vmem:[#allocation8] sm:$0xff] }
 0x1cf   :  { %v2646_v0 = vadd.f32 %v792_v1, %v732_v58  ;;  %v625_v39 = vrot.slane %v601_v2, 1  ;;  %v604_v16 = vmul.f32 %v567_v8, %v2363_v17  ;;  %v709_v44 = vrot.slane %v601_v2, 2  ;;  %v1111_v8 = vld [vmem:[#allocation8 + $0x18] sm:$0xff] }
 0x1d0   :  { %v793_v17 = vrot.slane %v601_v2, 3  ;;  %v2666_v58 = vmul.f32 %v582_v11, %v2377_v25  ;;  %1133 = vmatpush.msra.mxu1 %v1111_v8  ;;  %v899_v20 = vmul.f32 1.442695, %v887_v24  ;;  %v2682_v11 = vmul.f32 1.442695, %v980_v13  ;;  %v2689_v24 = vpop.eup %2037 }
 0x1d1   :  { %v649_v40 = vadd.f32 %v625_v39, %v601_v2  ;;  %v888_v36 = vmin.f32 %v2646_v0, 0.0  ;;  %v628_v60 = vrot.slane %v604_v16, 1  ;;  %v712_v42 = vrot.slane %v604_v16, 2 }
 0x1d2   :  { %v796_v53 = vrot.slane %v604_v16, 3  ;;  %v631_v5 = vrot.slane %v2666_v58, 1  ;;  %1134 = vmatpush.msra.mxu1 %v1110_v48  ;;  %vm876_vm3 = vcmp.gt.f32.partialorder %v2646_v0, 0.0 }
 0x1d3   :  { %v733_v15 = vadd.f32 %v709_v44, %v649_v40  ;;  %v652_v7 = vadd.f32 %v628_v60, %v604_v16  ;;  %v901_v12 = vmul.f32 1.442695, %v888_v36  ;;  %v1109_v40 = vld [vmem:[#allocation8 + $0x8] sm:$0xff]  ;;  %v907_v36 = vmul.f32 1.442695, %v891_v62 }
 0x1d4   :  { %v557_v38 = vpop.permute.xlu1 %556  ;;  %1135 = vmatpush.msra.mxu1 %v1109_v40 }
 0x1d5   :  { %v2662_v51 = vadd.f32 %v793_v17, %v733_v15  ;;  %v602_v37 = vmul.f32 %v557_v38, %v2354_v14  ;;  %v736_v22 = vadd.f32 %v712_v42, %v652_v7  ;;  %v798_v14 = vrot.slane %v2626_v50, 3 }
 0x1d6   :  { %v587_v1 = vpop.permute.xlu0 %586  ;;  %2039 = vpow2.f32 %v901_v12  ;;  %v874_v38 = vadd.f32 %v1922_v27, %v790_v33  ;;  %1136 = vmatpush.msra.mxu1 %v1108_v63  ;;  %v715_v27 = vrot.slane %v2666_v58, 2 }
 0x1d7   :  { %v889_v2 = vmin.f32 %v2662_v51, 0.0  ;;  %v626_v55 = vrot.slane %v602_v37, 1  ;;  %v2675_v39 = vadd.f32 %v796_v53, %v736_v22  ;;  %v608_v25 = vmul.f32 %v587_v1, %v2380_v26 }
 0x1d8   :  { %v710_v35 = vrot.slane %v602_v37, 2  ;;  %v2678_v44 = vadd.f32 %v798_v14, %v738_v32  ;;  %v794_v60 = vrot.slane %v602_v37, 3  ;;  %v655_v32 = vadd.f32 %v631_v5, %v2666_v58 }
 0x1d9   :  { %v903_v16 = vmul.f32 1.442695, %v889_v2  ;;  %v650_v4 = vadd.f32 %v626_v55, %v602_v37  ;;  %v632_v34 = vrot.slane %v608_v25, 1  ;;  %v892_v26 = vmin.f32 %v2675_v39, 0.0 }
 0x1da   :  { %v716_v15 = vrot.slane %v608_v25, 2  ;;  %v894_v22 = vmin.f32 %v2678_v44, 0.0  ;;  %v2694_v1 = vmul.f32 0.25, %v873_v10  ;;  %v800_v33 = vrot.slane %v608_v25, 3 }
 0x1db   :  { %2041 = vpow2.f32 %v903_v16  ;;  %v734_v50 = vadd.f32 %v710_v35, %v650_v4  ;;  %v656_v31 = vadd.f32 %v632_v34, %v608_v25  ;;  %v909_v62 = vmul.f32 1.442695, %v892_v26 }
 0x1dc   :  { %v572_v17 = vpop.permute.xlu1 %571  ;;  %2043 = vpow2.f32 %v997_v57  ;;  %v739_v14 = vadd.f32 %v715_v27, %v655_v32  ;;  %v913_v4 = vmul.f32 1.442695, %v894_v22  ;;  %v2707_v63 = vmul.f32 0.25, %v874_v38 }
 0x1dd   :  { %v2684_v7 = vadd.f32 %v794_v60, %v734_v50  ;;  %v605_v42 = vmul.f32 %v572_v17, %v2369_v21  ;;  %2045 = vpow2.f32 %v899_v20  ;;  %v740_v37 = vadd.f32 %v716_v15, %v656_v31  ;;  %v2040_v21 = vpop.eup %2039 }
 0x1de   :  { %v597_v12 = vpop.permute.xlu0 %596  ;;  %2047 = vpow2.f32 %v907_v36  ;;  %v1924_v35 = vadd.f32 -1.0, %v2040_v21  ;;  %vm877_vm6 = vcmp.gt.f32.partialorder %v2662_v51, 0.0  ;;  %v981_v32 = vmin.f32 %v2694_v1, 0.0 }
 0x1df   :  { %v890_v13 = vmin.f32 %v2684_v7, 0.0  ;;  %v629_v53 = vrot.slane %v605_v42, 1  ;;  %v610_v57 = vmul.f32 %v597_v12, %v2390_v29  ;;  %v713_v48 = vrot.slane %v605_v42, 2 }
 0x1e0   :  { %2049 = vpow2.f32 %v2659_v49  ;;  %v2699_v20 = vadd.f32 %v800_v33, %v740_v37  ;;  %v797_v5 = vrot.slane %v605_v42, 3  ;;  %v799_v49 = vrot.slane %v2666_v58, 3 }
 0x1e1   :  { %v2042_v2 = vpop.eup %2041  ;;  %v905_v55 = vmul.f32 1.442695, %v890_v13  ;;  %v653_v8 = vadd.f32 %v629_v53, %v605_v42  ;;  %v634_v16 = vrot.slane %v610_v57, 1  ;;  %v718_v36 = vrot.slane %v610_v57, 2 }
 0x1e2   :  { %v2701_v10 = vpop.eup %2043  ;;  %v1925_v34 = vadd.f32 -1.0, %v2042_v2  ;;  %v896_v26 = vmin.f32 %v2699_v20, 0.0  ;;  %v802_v15 = vrot.slane %v610_v57, 3  ;;  %v2713_v42 = vsel %vm876_vm3, %v2646_v0, %v1924_v35 }
 0x1e3   :  { %2051 = vpow2.f32 %v905_v55  ;;  %v737_v40 = vadd.f32 %v713_v48, %v653_v8  ;;  %v2046_v25 = vpop.eup %2045  ;;  %v658_v29 = vadd.f32 %v634_v16, %v610_v57  ;;  %v2721_v12 = vadd.f32 %v799_v49, %v739_v14 }
 0x1e4   :  { %2053 = vpow2.f32 %v909_v62  ;;  %v2048_v50 = vpop.eup %2047  ;;  %v1923_v38 = vadd.f32 -1.0, %v2046_v25  ;;  %v2719_v37 = vsel %vm877_vm6, %v2662_v51, %v1925_v34  ;;  %v1043_v33 = vrot.slane %v2713_v42, 7 }
 0x1e5   :  { %v2705_v60 = vadd.f32 %v797_v5, %v737_v40  ;;  %v742_v31 = vadd.f32 %v718_v36, %v658_v29  ;;  %2055 = vpow2.f32 %v913_v4  ;;  %v1927_v0 = vadd.f32 -1.0, %v2048_v50 }
 0x1e6   :  { %v2710_v17 = vpop.eup %2049  ;;  %v917_v2 = vmul.f32 1.442695, %v896_v26  ;;  %v1046_v55 = vrot.slane %v2719_v37, 6  ;;  %vm878_vm10 = vcmp.gt.f32.partialorder %v2684_v7, 0.0  ;;  %v2732_v14 = vsel %vm875_vm8, %v2649_v56, %v1923_v38 }
 0x1e7   :  { %v893_v58 = vmin.f32 %v2705_v60, 0.0  ;;  %v2723_v22 = vadd.f32 %v802_v15, %v742_v31  ;;  %v2741_v34 = vsel %vm879_vm11, %v2656_v19, %v1927_v0  ;;  %v1045_v56 = vsel %vm1044_vm4, %v1043_v33, %v2732_v14 }
 0x1e8   :  { %v592_v13 = vpop.permute.xlu1 %591  ;;  %vm880_vm15 = vcmp.gt.f32.partialorder %v2675_v39, 0.0  ;;  %v982_v38 = vmin.f32 %v2707_v63, 0.0  ;;  %vm882_vm2 = vcmp.gt.f32.partialorder %v2678_v44, 0.0  ;;  %vm881_vm3 = vcmp.gt.f32.partialorder %v2705_v60, 0.0 }
 0x1e9   :  { %v2052_v53 = vpop.eup %2051  ;;  %v911_v21 = vmul.f32 1.442695, %v893_v58  ;;  %v609_v62 = vmul.f32 %v592_v13, %v2387_v28  ;;  %v898_v51 = vmin.f32 %v2723_v22, 0.0  ;;  %v895_v28 = vmin.f32 %v2721_v12, 0.0 }
 0x1ea   :  { %v2054_v27 = vpop.eup %2053  ;;  %v1926_v57 = vadd.f32 -1.0, %v2052_v53  ;;  %v1052_v58 = vrot.slane %v2741_v34, 4  ;;  %v1003_v53 = vmul.f32 1.442695, %v981_v32  ;;  %v1939_v33 = vadd.f32 -1.0, %v2633_v47 }
 0x1eb   :  { %v633_v8 = vrot.slane %v609_v62, 1  ;;  %2057 = vpow2.f32 %v911_v21  ;;  %v2056_v48 = vpop.eup %2055  ;;  %v717_v35 = vrot.slane %v609_v62, 2  ;;  %v1928_v40 = vadd.f32 -1.0, %v2054_v27 }
 0x1ec   :  { %v2737_v16 = vsel %vm878_vm10, %v2684_v7, %v1926_v57  ;;  %2059 = vpow2.f32 %v917_v2  ;;  %v921_v25 = vmul.f32 1.442695, %v898_v51  ;;  %v801_v36 = vrot.slane %v609_v62, 3 }
 0x1ed   :  { %v657_v4 = vadd.f32 %v633_v8, %v609_v62  ;;  %v1049_v5 = vrot.slane %v2737_v16, 5  ;;  %v1930_v50 = vadd.f32 -1.0, %v2056_v48  ;;  %v1048_v7 = vsel %vm1047_vm5, %v1046_v55, %v1045_v56 }
 0x1ee   :  { %v915_v49 = vmul.f32 1.442695, %v895_v28  ;;  %2061 = vpow2.f32 %v2682_v11  ;;  %v2752_v15 = vsel %vm880_vm15, %v2675_v39, %v1928_v40  ;;  %v1005_v2 = vmul.f32 1.442695, %v982_v38 }
 0x1ef   :  { %v741_v29 = vadd.f32 %v717_v35, %v657_v4  ;;  %v1051_v26 = vsel %vm1050_vm7, %v1049_v5, %v1048_v7  ;;  %2063 = vpow2.f32 %v921_v25  ;;  %v2761_v11 = vsel %vm882_vm2, %v2678_v44, %v1930_v50 }
 0x1f0   :  { %v1054_v39 = vsel %vm1053_vm9, %v1052_v58, %v1051_v26  ;;  %2065 = vpow2.f32 %v915_v49  ;;  %v1055_v27 = vrot.slane %v2752_v15, 3  ;;  %v1940_v51 = vadd.f32 -1.0, %v2689_v24 }
 0x1f1   :  { %v2058_v31 = vpop.eup %2057  ;;  %v2749_v19 = vadd.f32 %v801_v36, %v741_v29  ;;  %v1061_v8 = vrot.slane %v2761_v11, 1  ;;  %2067 = vpow2.f32 %v1003_v53  ;;  %v1941_v48 = vadd.f32 -1.0, %v2672_v52 }
 0x1f2   :  { %v1929_v13 = vadd.f32 -1.0, %v2058_v31  ;;  %v2060_v21 = vpop.eup %2059  ;;  %v1057_v44 = vsel %vm1056_vm12, %v1055_v27, %v1054_v39  ;;  %v1095_v47 = vsel %vm1056_vm12, %v1084_v30, %v1083_v23  ;;  %v1086_v35 = vperm.slane %v2617_v41, 0 }
 0x1f3   :  { %v897_v0 = vmin.f32 %v2749_v19, 0.0  ;;  %vm964_vm6 = vcmp.gt.f32.partialorder %v2597_v9, 0.0  ;;  %v1942_v40 = vadd.f32 -1.0, %v2701_v10  ;;  %v1096_v52 = vsel %vm1059_vm13, %v1085_v3, %v1095_v47 }
 0x1f4   :  { %v2765_v62 = vsel %vm881_vm3, %v2705_v60, %v1929_v13  ;;  %v2062_v55 = vpop.eup %2061  ;;  %v1932_v60 = vadd.f32 -1.0, %v2060_v21  ;;  %vm965_vm8 = vcmp.gt.f32.partialorder %v2582_v59, 0.0  ;;  %v2790_v23 = vsel %vm964_vm6, %v2597_v9, %v1940_v51 }
 0x1f5   :  { %v919_v57 = vmul.f32 1.442695, %v897_v0  ;;  %v1058_v32 = vrot.slane %v2765_v62, 2  ;;  %v2064_v4 = vpop.eup %2063  ;;  %vm884_vm10 = vcmp.gt.f32.partialorder %v2699_v20, 0.0  ;;  %v1943_v5 = vadd.f32 -1.0, %v2710_v17 }
 0x1f6   :  { %v2066_v30 = vpop.eup %2065  ;;  %v2797_v10 = vsel %vm963_vm1, %v2571_v18, %v1939_v33  ;;  %v2800_v25 = vsel %vm965_vm8, %v2582_v59, %v1941_v48  ;;  %v1934_v3 = vadd.f32 -1.0, %v2064_v4  ;;  %v2803_v56 = vsel %vm884_vm10, %v2699_v20, %v1932_v60  ;;  %v1975_v4 = vld [vmem:[%s3108_s4] ss:$0 sm:$0xff] }
 0x1f7   :  { %2069 = vpow2.f32 %v919_v57  ;;  %v1060_v28 = vsel %vm1059_vm13, %v1058_v32, %v1057_v44  ;;  %vm966_vm11 = vcmp.gt.f32.partialorder %v2621_v45, 0.0  ;;  %vm967_vm15 = vcmp.gt.f32.partialorder %v2631_v46, 0.0  ;;  %v2068_v9 = vpop.eup %2067 }
 0x1f8   :  { %v1063_v24 = vsel %vm1062_vm14, %v1061_v8, %v1060_v28  ;;  %2071 = vpow2.f32 %v1005_v2  ;;  %vm968_vm2 = vcmp.gt.f32.partialorder %v2639_v54, 0.0  ;;  %v1944_v17 = vadd.f32 -1.0, %v2062_v55 }
 0x1f9   :  { %1947 = vmatmul.msk.f32.vlgmr.msra.gmra.mxu1 %vm115_vm0, %v1063_v24  ;;  %v2809_v29 = vsel %vm966_vm11, %v2621_v45, %v1942_v40  ;;  %v1088_v18 = vperm.slane %v2790_v23, 0  ;;  %v1931_v59 = vadd.f32 -1.0, %v2066_v30  ;;  %vm969_vm1 = vcmp.gt.f32.partialorder %v2694_v1, 0.0 }
 0x1fa   :  { %v1087_v20 = vperm.slane %v2797_v10, 0  ;;  %v1089_v50 = vperm.slane %v2800_v25, 0  ;;  %vm886_vm3 = vcmp.gt.f32.partialorder %v2723_v22, 0.0  ;;  %v1064_v49 = vrot.slane %v2803_v56, 7 }
 0x1fb   :  { %v2818_v26 = vsel %vm967_vm15, %v2631_v46, %v1943_v5  ;;  %vm885_vm6 = vcmp.gt.f32.partialorder %v2749_v19, 0.0  ;;  %v2822_v31 = vsel %vm886_vm3, %v2723_v22, %v1934_v3  ;;  %v1945_v58 = vadd.f32 -1.0, %v2068_v9 }
 0x1fc   :  { %v1090_v38 = vperm.slane %v2809_v29, 0  ;;  %vm883_vm8 = vcmp.gt.f32.partialorder %v2721_v12, 0.0  ;;  %v2832_v53 = vsel %vm968_vm2, %v2639_v54, %v1944_v17  ;;  %v1098_v46 = vsel %vm1044_vm4, %v1088_v18, %v1087_v20 }
 0x1fd   :  { %v2070_v36 = vpop.eup %2069  ;;  %v2836_v0 = vsel %vm883_vm8, %v2721_v12, %v1931_v59  ;;  %v1091_v39 = vperm.slane %v2818_v26, 0  ;;  %v1099_v21 = vsel %vm1047_vm5, %v1089_v50, %v1098_v46  ;;  %v1068_v27 = vrot.slane %v2822_v31, 5 }
 0x1fe   :  { %v1933_v7 = vadd.f32 -1.0, %v2070_v36  ;;  %v2072_v45 = vpop.eup %2071  ;;  %vm1106_vm10 = vcmask 1043456   ;;  %v2848_v12 = vsel %vm969_vm1, %v2694_v1, %v1945_v58  ;;  %v1097_v32 = vsel %vm1062_vm14, %v1086_v35, %v1096_v52  ;;  %v1976_v35 = vld [vmem:[%s3108_s4 + $0x1] ss:$0 sm:$0xff]  ;;  %s2279_s4 = smov 64  }
 0x1ff   :  { %v1946_v33 = vadd.f32 -1.0, %v2072_v45  ;;  %vm970_vm11 = vcmp.gt.f32.partialorder %v2707_v63, 0.0  ;;  %v1092_v51 = vperm.slane %v2832_v53, 0  ;;  %v1100_v55 = vsel %vm1050_vm7, %v1090_v38, %v1099_v21 }
 0x200   :  { %v2827_v13 = vsel %vm885_vm6, %v2749_v19, %v1933_v7  ;;  %v1065_v19 = vsel %vm1044_vm4, %v1064_v49, %v2836_v0  ;;  %v1093_v1 = vperm.slane %v2848_v12, 0  ;;  %v1101_v8 = vsel %vm1053_vm9, %v1091_v39, %v1100_v55 }
 0x201   :  { %v1066_v22 = vrot.slane %v2827_v13, 6  ;;  %v2858_v44 = vsel %vm970_vm11, %v2707_v63, %v1946_v33  ;;  %v1102_v60 = vsel %vm1056_vm12, %v1092_v51, %v1101_v8  ;;  %vm1221_vm9 = vcmask 2048  }
 0x202   :  { %v1094_v48 = vperm.slane %v2858_v44, 0  ;;  %v1103_v28 = vsel %vm1059_vm13, %v1093_v1, %v1102_v60  ;;  %vm1563_vm12 = vcmask 1040384   ;;  %vm1522_vm13 = vcmask 256000  }
 0x203   :  { %v1067_v54 = vsel %vm1047_vm5, %v1066_v22, %v1065_v19 }
 0x204   :  { %v1069_v57 = vsel %vm1050_vm7, %v1068_v27, %v1067_v54  ;;  %v1104_v47 = vsel %vm1062_vm14, %v1094_v48, %v1103_v28 }
 0x205   :  { %v1107_v2 = vsel %vm1106_vm10, %v1069_v57, %v1097_v32 }
 0x206   :  { %1948 = vmatmul.msk.f32.gmra.mxu1 %vm115_vm0, %v1107_v2 }
 0x20e   :  { %1949 = vmatmul.msk.f32.gmra.mxu1 %vm115_vm0, %v1104_v47 }
 0x276   :  { %v1138_v63 = vpop.f32.mrf.mxu1 }
 0x277   :  { %v1139_v24 = vadd.f32 %v1975_v4, %v1138_v63 }
 0x279   :  { %2073 = vtanh.f32 %v1139_v24 }
 0x27f   :  { %v2074_v40 = vpop.eup %2073 }
 0x280   :  { %v1152_v52 = vmul.f32 %v2074_v40, %v1976_v35 }
 0x282   :  { %v1155_v30 = vsel %vm115_vm0, %v1152_v52, 0.0 }
 0x283   :  { %1156 = vadd.xlane.f32.xlu0 %v1155_v30  ;;  %v1141_v5 = vpop.f32.mrf.mxu1 }
 0x284   :  { %v1142_v3 = vadd.f32 %v1975_v4, %v1141_v5 }
 0x286   :  { %2075 = vtanh.f32 %v1142_v3 }
 0x28b   :  { %v1144_v9 = vpop.f32.mrf.mxu1 }
 0x28c   :  { %v2076_v17 = vpop.eup %2075  ;;  %v1145_v18 = vadd.f32 %v1975_v4, %v1144_v9 }
 0x28d   :  { %v1153_v36 = vmul.f32 %v2076_v17, %v1976_v35 }
 0x28e   :  { %2077 = vtanh.f32 %v1145_v18 }
 0x28f   :  { %v1158_v59 = vsel %vm115_vm0, %v1153_v36, 0.0 }
 0x290   :  { %1159 = vadd.xlane.f32.xlu1 %v1158_v59 }
 0x294   :  { %v2078_v20 = vpop.eup %2077 }
 0x295   :  { %v1154_v50 = vmul.f32 %v2078_v20, %v1976_v35 }
 0x297   :  { %v1161_v7 = vsel %vm115_vm0, %v1154_v50, 0.0 }
 0x298   :  { %1162 = vadd.xlane.f32.xlu2 %v1161_v7  ;;  %v2278_v7 = vmov 0  }
 0x299   :  { %1972 = vset.pattern.permute.xlu2 %v2278_v7  ;;  %1973 = vset.pattern.permute.xlu1 %v2278_v7 }
 0x29a   :  { %1974 = vset.pattern.permute.xlu0 %v2278_v7 }
 0x2f6   :  { %v1157_v39 = vpop.xlane.xlu0 %1156 }
 0x303   :  { %v1160_v49 = vpop.xlane.xlu1 %1159 }
 0x304   :  { %v1164_v45 = vmul.f32 3.0, %v1160_v49 }
 0x306   :  { %v1168_v46 = vrot.slane %v1164_v45, 4 }
 0x30b   :  { %v1163_v58 = vpop.xlane.xlu2 %1162 }
 0x30c   :  { %v1165_v38 = vmul.f32 3.0, %v1163_v58 }
 0x30e   :  { %v1169_v22 = vrot.slane %v1165_v38, 4 }
 0x310   :  { %v1170_v21 = vsel %vm1106_vm10, %v1168_v46, %v1169_v22  ;;  %v1174_v60 = vadd.f32 %v1169_v22, %v1160_v49 }
 0x311   :  { %v1173_v19 = vadd.f32 %v1170_v21, %v1157_v39 }
 0x312   :  { %v2888_v35 = vmul.f32 0.25, %v1174_v60 }
 0x313   :  { %v2877_v27 = vmul.f32 0.25, %v1173_v19 }
 0x314   :  { %v1186_v50 = vrot.slane %v2888_v35, 1  ;;  %v1187_v58 = vrot.slane %v2888_v35, 2  ;;  %v1188_v22 = vrot.slane %v2888_v35, 3 }
 0x315   :  { %v1179_v33 = vrot.slane %v2877_v27, 1  ;;  %v1180_v54 = vrot.slane %v2877_v27, 2  ;;  %1199 = vst [vmem:[#allocation1] ss:$9 sm:$0xff] %v2877_v27  ;;  %v1181_v57 = vrot.slane %v2877_v27, 3  ;;  %v1182_v32 = vrot.slane %v2877_v27, 4 }
 0x316   :  { %v1183_v51 = vrot.slane %v2877_v27, 5  ;;  %v1184_v47 = vrot.slane %v2877_v27, 6  ;;  %v1185_v4 = vrot.slane %v2877_v27, 7 }
 0x317   :  { %1201 = vst [vmem:[#allocation1 + $0x1] ss:$9 sm:$0xff] %v1179_v33 }
 0x318   :  { %1203 = vst [vmem:[#allocation1 + $0x2] ss:$9 sm:$0xff] %v1180_v54 }
 0x31f   :  { %v1204_v2 = vld [vmem:[#allocation1] sm:$0xff] }
 0x320   :  { %1205 = vst [vmem:[#allocation1] ss:$9 sm:$0xff] %v1181_v57  ;;  %v1222_v55 = vsel %vm1221_vm9, %v1204_v2, -inf }
 0x321   :  { %1206 = vst [vmem:[#allocation1 + $0x1] ss:$9 sm:$0xff] %v1182_v32  ;;  %v1223_v1 = vrot.slane %v1222_v55, 4 }
 0x322   :  { %1207 = vst [vmem:[#allocation1 + $0x2] ss:$9 sm:$0xff] %v1183_v51 }
 0x323   :  { %v1224_v8 = vmax.f32 %v1222_v55, %v1223_v1 }
 0x325   :  { %v1225_v48 = vrot.slane %v1224_v8, 2 }
 0x327   :  { %v1226_v28 = vmax.f32 %v1224_v8, %v1225_v48 }
 0x329   :  { %v1208_v63 = vld [vmem:[#allocation1] sm:$0xff]  ;;  %v1227_v24 = vrot.slane %v1226_v28, 1 }
 0x32a   :  { %1209 = vst [vmem:[#allocation1] ss:$9 sm:$0xff] %v1184_v47  ;;  %v1229_v40 = vsel %vm1221_vm9, %v1208_v63, -inf }
 0x32b   :  { %1210 = vst [vmem:[#allocation1 + $0x1] ss:$9 sm:$0xff] %v1185_v4  ;;  %v1228_v52 = vmax.f32 %v1226_v28, %v1227_v24  ;;  %v1230_v30 = vrot.slane %v1229_v40, 4 }
 0x32c   :  { %1211 = vst [vmem:[#allocation1 + $0x2] ss:$9 sm:$0xff] %v2888_v35 }
 0x32d   :  { %v1254_v5 = vrot.slane %v1228_v52, 1  ;;  %v1255_v3 = vrot.slane %v1228_v52, 2  ;;  %v1270_v9 = vsub.f32 %v2877_v27, %v1228_v52  ;;  %v1231_v17 = vmax.f32 %v1229_v40, %v1230_v30 }
 0x32f   :  { %v1271_v18 = vsub.f32 %v1179_v33, %v1254_v5  ;;  %v1272_v36 = vsub.f32 %v1180_v54, %v1255_v3  ;;  %v1232_v59 = vrot.slane %v1231_v17, 2  ;;  %v1282_v20 = vmul.f32 1.442695, %v1270_v9 }
 0x331   :  { %v1284_v49 = vmul.f32 1.442695, %v1271_v18  ;;  %v1233_v45 = vmax.f32 %v1231_v17, %v1232_v59  ;;  %v1286_v46 = vmul.f32 1.442695, %v1272_v36  ;;  %2079 = vpow2.f32 %v1282_v20 }
 0x333   :  { %v1212_v38 = vld [vmem:[#allocation1] sm:$0xff]  ;;  %v1234_v21 = vrot.slane %v1233_v45, 1  ;;  %2081 = vpow2.f32 %v1284_v49 }
 0x334   :  { %1213 = vst [vmem:[#allocation1] ss:$9 sm:$0xff] %v1186_v50  ;;  %v1236_v39 = vsel %vm1221_vm9, %v1212_v38, -inf  ;;  %2083 = vpow2.f32 %v1286_v46 }
 0x335   :  { %1214 = vst [vmem:[#allocation1 + $0x1] ss:$9 sm:$0xff] %v1187_v58  ;;  %v1237_v19 = vrot.slane %v1236_v39, 4  ;;  %v1235_v33 = vmax.f32 %v1233_v45, %v1234_v21 }
 0x336   :  { %1215 = vst [vmem:[#allocation1 + $0x2] ss:$9 sm:$0xff] %v1188_v22 }
 0x337   :  { %v1238_v54 = vmax.f32 %v1236_v39, %v1237_v19  ;;  %v1256_v2 = vrot.slane %v1235_v33, 1  ;;  %v1257_v55 = vrot.slane %v1235_v33, 2  ;;  %v1273_v1 = vsub.f32 %v1181_v57, %v1235_v33  ;;  %v2907_v28 = vpop.eup %2079 }
 0x339   :  { %v1239_v8 = vrot.slane %v1238_v54, 2  ;;  %v1274_v48 = vsub.f32 %v1182_v32, %v1256_v2  ;;  %v1275_v60 = vsub.f32 %v1183_v51, %v1257_v55  ;;  %v1288_v24 = vmul.f32 1.442695, %v1273_v1  ;;  %v2909_v40 = vpop.eup %2081 }
 0x33a   :  { %v2911_v30 = vpop.eup %2083 }
 0x33b   :  { %v1240_v63 = vmax.f32 %v1238_v54, %v1239_v8  ;;  %v1290_v52 = vmul.f32 1.442695, %v1274_v48  ;;  %v1292_v9 = vmul.f32 1.442695, %v1275_v60  ;;  %2085 = vpow2.f32 %v1288_v24 }
 0x33d   :  { %v1216_v5 = vld [vmem:[#allocation1] sm:$0xff]  ;;  %v1241_v3 = vrot.slane %v1240_v63, 1  ;;  %2087 = vpow2.f32 %v1290_v52 }
 0x33e   :  { %v1243_v17 = vsel %vm1221_vm9, %v1216_v5, -inf  ;;  %1318 = vst [vmem:[#allocation1] ss:$9 sm:$0xff] %v2907_v28  ;;  %2089 = vpow2.f32 %v1292_v9 }
 0x33f   :  { %v1242_v57 = vmax.f32 %v1240_v63, %v1241_v3  ;;  %v1244_v18 = vrot.slane %v1243_v17, 4  ;;  %1320 = vst [vmem:[#allocation1 + $0x1] ss:$9 sm:$0xff] %v2909_v40 }
 0x340   :  { %1322 = vst [vmem:[#allocation1 + $0x2] ss:$9 sm:$0xff] %v2911_v30 }
 0x341   :  { %v1245_v32 = vmax.f32 %v1243_v17, %v1244_v18  ;;  %v1258_v51 = vrot.slane %v1242_v57, 1  ;;  %v1259_v36 = vrot.slane %v1242_v57, 2  ;;  %v2920_v49 = vpop.eup %2085  ;;  %v1276_v46 = vsub.f32 %v1184_v47, %v1242_v57 }
 0x343   :  { %v1246_v59 = vrot.slane %v1245_v32, 2  ;;  %v1277_v20 = vsub.f32 %v1185_v4, %v1258_v51  ;;  %v1278_v7 = vsub.f32 %v2888_v35, %v1259_v36  ;;  %v2924_v39 = vpop.eup %2087  ;;  %v1294_v1 = vmul.f32 1.442695, %v1276_v46 }
 0x344   :  { %v2926_v19 = vpop.eup %2089 }
 0x345   :  { %v1247_v45 = vmax.f32 %v1245_v32, %v1246_v59  ;;  %v1296_v38 = vmul.f32 1.442695, %v1277_v20  ;;  %v1298_v21 = vmul.f32 1.442695, %v1278_v7 }
 0x347   :  { %v1248_v33 = vrot.slane %v1247_v45, 1  ;;  %v1323_v54 = vld [vmem:[#allocation1] sm:$0xff]  ;;  %2091 = vpow2.f32 %v1296_v38 }
 0x348   :  { %v1340_v2 = vsel %vm1221_vm9, %v1323_v54, 0.0  ;;  %1324 = vst [vmem:[#allocation1] ss:$9 sm:$0xff] %v2920_v49  ;;  %2093 = vpow2.f32 %v1298_v21 }
 0x349   :  { %v1249_v4 = vmax.f32 %v1247_v45, %v1248_v33  ;;  %v1341_v55 = vrot.slane %v1340_v2, 4  ;;  %1325 = vst [vmem:[#allocation1 + $0x1] ss:$9 sm:$0xff] %v2924_v39  ;;  %2095 = vpow2.f32 %v1294_v1 }
 0x34a   :  { %1326 = vst [vmem:[#allocation1 + $0x2] ss:$9 sm:$0xff] %v2926_v19 }
 0x34b   :  { %v1261_v27 = vrot.slane %v1249_v4, 2  ;;  %v1279_v47 = vsub.f32 %v1186_v50, %v1249_v4  ;;  %v1342_v8 = vadd.f32 %v1341_v55, %v1340_v2  ;;  %v1260_v48 = vrot.slane %v1249_v4, 1 }
 0x34d   :  { %v1281_v60 = vsub.f32 %v1188_v22, %v1261_v27  ;;  %v1343_v63 = vrot.slane %v1342_v8, 2  ;;  %v1280_v24 = vsub.f32 %v1187_v58, %v1260_v48  ;;  %v1300_v52 = vmul.f32 1.442695, %v1279_v47  ;;  %v2938_v5 = vpop.eup %2091 }
 0x34e   :  { %v2940_v17 = vpop.eup %2093 }
 0x34f   :  { %v1304_v3 = vmul.f32 1.442695, %v1281_v60  ;;  %v1344_v9 = vadd.f32 %v1343_v63, %v1342_v8  ;;  %v1302_v57 = vmul.f32 1.442695, %v1280_v24  ;;  %2097 = vpow2.f32 %v1300_v52  ;;  %v2096_v22 = vpop.eup %2095 }
 0x351   :  { %v1345_v18 = vrot.slane %v1344_v9, 1  ;;  %v1327_v50 = vld [vmem:[#allocation1] sm:$0xff]  ;;  %2099 = vpow2.f32 %v1304_v3 }
 0x352   :  { %v1347_v32 = vsel %vm1221_vm9, %v1327_v50, 0.0  ;;  %1329 = vst [vmem:[#allocation1 + $0x1] ss:$9 sm:$0xff] %v2938_v5  ;;  %2101 = vpow2.f32 %v1302_v57 }
 0x353   :  { %v1346_v51 = vadd.f32 %v1345_v18, %v1344_v9  ;;  %v1348_v35 = vrot.slane %v1347_v32, 4  ;;  %1330 = vst [vmem:[#allocation1 + $0x2] ss:$9 sm:$0xff] %v2940_v17 }
 0x354   :  { %1328 = vst [vmem:[#allocation1] ss:$9 sm:$0xff] %v2096_v22 }
 0x355   :  { %2103 = vrcp.f32 %v1346_v51  ;;  %v1349_v58 = vadd.f32 %v1348_v35, %v1347_v32  ;;  %v2098_v59 = vpop.eup %2097 }
 0x357   :  { %v1350_v36 = vrot.slane %v1349_v58, 2  ;;  %v2100_v20 = vpop.eup %2099 }
 0x358   :  { %v2102_v45 = vpop.eup %2101 }
 0x359   :  { %v1351_v7 = vadd.f32 %v1350_v36, %v1349_v58 }
 0x35b   :  { %v2104_v38 = vpop.eup %2103  ;;  %v1352_v46 = vrot.slane %v1351_v7, 1  ;;  %v1331_v21 = vld [vmem:[#allocation1] sm:$0xff] }
 0x35c   :  { %v1392_v33 = vmul.f32 %v2104_v38, %v2907_v28  ;;  %v1377_v54 = vrot.slane %v2104_v38, 2  ;;  %v1376_v2 = vrot.slane %v2104_v38, 1  ;;  %v1354_v4 = vsel %vm1221_vm9, %v1331_v21, 0.0  ;;  %1332 = vst [vmem:[#allocation1] ss:$9 sm:$0xff] %v2098_v59 }
 0x35d   :  { %v1353_v55 = vadd.f32 %v1352_v46, %v1351_v7  ;;  %v1355_v1 = vrot.slane %v1354_v4, 4  ;;  %1334 = vst [vmem:[#allocation1 + $0x2] ss:$9 sm:$0xff] %v2100_v20 }
 0x35e   :  { %1406 = vperm.xlu2 %1972, %v1392_v33   ;;  %v1394_v27 = vmul.f32 %v2911_v30, %v1377_v54  ;;  %v1393_v47 = vmul.f32 %v2909_v40, %v1376_v2  ;;  %1333 = vst [vmem:[#allocation1 + $0x1] ss:$9 sm:$0xff] %v2102_v45 }
 0x35f   :  { %2105 = vrcp.f32 %v1353_v55  ;;  %v1356_v8 = vadd.f32 %v1355_v1, %v1354_v4 }
 0x360   :  { %1418 = vperm.xlu0 %1974, %v1394_v27   ;;  %1412 = vperm.xlu1 %1973, %v1393_v47  }
 0x361   :  { %v1357_v48 = vrot.slane %v1356_v8, 2 }
 0x363   :  { %v1358_v28 = vadd.f32 %v1357_v48, %v1356_v8 }
 0x365   :  { %v2106_v60 = vpop.eup %2105  ;;  %v1359_v63 = vrot.slane %v1358_v28, 1  ;;  %v1335_v24 = vld [vmem:[#allocation1] sm:$0xff] }
 0x366   :  { %v1395_v52 = vmul.f32 %v2106_v60, %v2920_v49  ;;  %v1378_v3 = vrot.slane %v2106_v60, 1  ;;  %v1361_v9 = vsel %vm1221_vm9, %v1335_v24, 0.0  ;;  %v1379_v50 = vrot.slane %v2106_v60, 2 }
 0x367   :  { %v1360_v57 = vadd.f32 %v1359_v63, %v1358_v28  ;;  %v1362_v18 = vrot.slane %v1361_v9, 4 }
 0x368   :  { %1424 = vperm.xlu2 %1972, %v1395_v52   ;;  %v1396_v40 = vmul.f32 %v2924_v39, %v1378_v3  ;;  %v1397_v35 = vmul.f32 %v2926_v19, %v1379_v50 }
 0x369   :  { %2107 = vrcp.f32 %v1360_v57  ;;  %v1363_v30 = vadd.f32 %v1362_v18, %v1361_v9 }
 0x36a   :  { %1430 = vperm.xlu1 %1973, %v1396_v40  }
 0x36b   :  { %v1364_v32 = vrot.slane %v1363_v30, 2 }
 0x36d   :  { %v1365_v51 = vadd.f32 %v1364_v32, %v1363_v30 }
 0x36f   :  { %v2108_v58 = vpop.eup %2107  ;;  %v1366_v36 = vrot.slane %v1365_v51, 1 }
 0x370   :  { %1436 = vperm.xlu2 %1972, %v1397_v35   ;;  %v1398_v49 = vmul.f32 %v2108_v58, %v2096_v22  ;;  %v1380_v38 = vrot.slane %v2108_v58, 1  ;;  %v1381_v46 = vrot.slane %v2108_v58, 2  ;;  %v1551_v22 = vrot.slane %v2591_v6, 3 }
 0x371   :  { %v1367_v7 = vadd.f32 %v1366_v36, %v1365_v51 }
 0x372   :  { %1442 = vperm.xlu1 %1973, %v1398_v49   ;;  %v1399_v21 = vmul.f32 %v2938_v5, %v1380_v38  ;;  %v1400_v39 = vmul.f32 %v2940_v17, %v1381_v46  ;;  %v1564_v5 = vsel %vm1563_vm12, %v2591_v6, %v1551_v22 }
 0x373   :  { %2109 = vrcp.f32 %v1367_v7 }
 0x378   :  { %1448 = vperm.xlu2 %1972, %v1399_v21  }
 0x379   :  { %v2110_v33 = vpop.eup %2109 }
 0x37a   :  { %1454 = vperm.xlu1 %1973, %v1400_v39   ;;  %v1382_v54 = vrot.slane %v2110_v33, 1  ;;  %v1383_v4 = vrot.slane %v2110_v33, 2  ;;  %v1401_v19 = vmul.f32 %v2110_v33, %v2098_v59 }
 0x37c   :  { %v1402_v2 = vmul.f32 %v2102_v45, %v1382_v54  ;;  %v1403_v55 = vmul.f32 %v2100_v20, %v1383_v4 }
 0x37e   :  { %1466 = vperm.xlu0 %1974, %v1402_v2  }
 0x380   :  { %1460 = vperm.xlu2 %1972, %v1401_v19  }
 0x382   :  { %1472 = vperm.xlu1 %1973, %v1403_v55  }
 0x3b8   :  { %v1407_v1 = vpop.permute.xlu2 %1406 }
 0x3b9   :  { %v1409_v27 = vperm.slane %v1407_v1, 0  ;;  %v1553_v1 = vrot.slane %v2604_v43, 3 }
 0x3bb   :  { %v1476_v17 = vmul.f32 %v1409_v27, %v2732_v14  ;;  %v2959_v47 = vmul.f32 %v1564_v5, %v1409_v27 }
 0x3bd   :  { %1500 = vst [vmem:[#allocation1] ss:$9 sm:$0xff] %v1476_v17  ;;  %v1566_v17 = vsel %vm1563_vm12, %v2604_v43, %v1553_v1  ;;  %v1555_v43 = vrot.slane %v2797_v10, 3 }
 0x3c2   :  { %v2961_v45 = vpop.permute.xlu2 %1424 }
 0x3c3   :  { %v1427_v14 = vperm.slane %v2961_v45, 0 }
 0x3c5   :  { %v1479_v3 = vmul.f32 %v1427_v14, %v2737_v16 }
 0x3ca   :  { %v2970_v6 = vpop.permute.xlu2 %1436 }
 0x3cb   :  { %v1439_v63 = vperm.slane %v2970_v6, 0 }
 0x3cd   :  { %v1481_v9 = vmul.f32 %v1439_v63, %v2752_v15 }
 0x3d2   :  { %v2963_v8 = vpop.permute.xlu0 %1418  ;;  %v1413_v20 = vpop.permute.xlu1 %1412 }
 0x3d3   :  { %v1421_v59 = vperm.slane %v2963_v8, 0  ;;  %v1415_v48 = vperm.slane %v1413_v20, 0  ;;  %v2986_v57 = vpop.permute.xlu2 %1448 }
 0x3d4   :  { %v1451_v40 = vperm.slane %v2986_v57, 0 }
 0x3d5   :  { %v1478_v28 = vmul.f32 %v1421_v59, %v2719_v37  ;;  %v1477_v60 = vmul.f32 %v1415_v48, %v2713_v42 }
 0x3d6   :  { %v1483_v30 = vmul.f32 %v1451_v40, %v2761_v11 }
 0x3d7   :  { %1504 = vst [vmem:[#allocation1 + $0x2] ss:$9 sm:$0xff] %v1478_v28 }
 0x3d8   :  { %1502 = vst [vmem:[#allocation1 + $0x1] ss:$9 sm:$0xff] %v1477_v60 }
 0x3db   :  { %v3004_v35 = vpop.permute.xlu2 %1460 }
 0x3dc   :  { %v2974_v24 = vpop.permute.xlu1 %1430 }
 0x3dd   :  { %v1433_v52 = vperm.slane %v2974_v24, 0  ;;  %v1558_v24 = vrot.slane %v2809_v29, 3 }
 0x3df   :  { %v1480_v42 = vmul.f32 %v1433_v52, %v2741_v34  ;;  %v1505_v37 = vld [vmem:[#allocation1] sm:$0xff] }
 0x3e0   :  { %1506 = vst [vmem:[#allocation1] ss:$9 sm:$0xff] %v1479_v3  ;;  %v1523_v38 = vsel %vm1522_vm13, %v1505_v37, 0.0  ;;  %v1590_v3 = vmul.f32 %v1566_v17, %v1421_v59 }
 0x3e1   :  { %1507 = vst [vmem:[#allocation1 + $0x1] ss:$9 sm:$0xff] %v1480_v42  ;;  %v1524_v54 = vrot.slane %v1523_v38, 4 }
 0x3e2   :  { %1508 = vst [vmem:[#allocation1 + $0x2] ss:$9 sm:$0xff] %v1481_v9 }
 0x3e3   :  { %v1525_v55 = vadd.f32 %v1524_v54, %v1523_v38 }
 0x3e4   :  { %v2988_v18 = vpop.permute.xlu1 %1442 }
 0x3e5   :  { %v1445_v16 = vperm.slane %v2988_v18, 0  ;;  %v1526_v5 = vrot.slane %v1525_v55, 2 }
 0x3e7   :  { %v1482_v34 = vmul.f32 %v1445_v16, %v2765_v62  ;;  %v1463_v62 = vperm.slane %v3004_v35, 0  ;;  %v1527_v9 = vadd.f32 %v1526_v5, %v1525_v55 }
 0x3e9   :  { %v1509_v15 = vld [vmem:[#allocation1] sm:$0xff]  ;;  %v1528_v8 = vrot.slane %v1527_v9, 1 }
 0x3ea   :  { %1510 = vst [vmem:[#allocation1] ss:$9 sm:$0xff] %v1482_v34  ;;  %v1530_v11 = vsel %vm1522_vm13, %v1509_v15, 0.0 }
 0x3eb   :  { %1511 = vst [vmem:[#allocation1 + $0x1] ss:$9 sm:$0xff] %v1483_v30  ;;  %v1531_v46 = vrot.slane %v1530_v11, 4  ;;  %v1529_v54 = vadd.f32 %v1528_v8, %v1527_v9 }
 0x3ec   :  { %v2998_v50 = vpop.permute.xlu1 %1454 }
 0x3ed   :  { %v1457_v32 = vperm.slane %v2998_v50, 0  ;;  %v1532_v4 = vadd.f32 %v1531_v46, %v1530_v11 }
 0x3ef   :  { %v1484_v51 = vmul.f32 %v1457_v32, %v2836_v0  ;;  %v1485_v0 = vmul.f32 %v1463_v62, %v2803_v56  ;;  %v1552_v56 = vrot.slane %v2593_v61, 3 }
 0x3f0   :  { %v3006_v58 = vpop.permute.xlu0 %1466 }
 0x3f1   :  { %1512 = vst [vmem:[#allocation1 + $0x2] ss:$9 sm:$0xff] %v1484_v51  ;;  %v1469_v36 = vperm.slane %v3006_v58, 0  ;;  %v1556_v51 = vrot.slane %v2790_v23, 3 }
 0x3f3   :  { %v1486_v39 = vmul.f32 %v1469_v36, %v2827_v13  ;;  %v1565_v13 = vsel %vm1563_vm12, %v2593_v61, %v1552_v56  ;;  %v1554_v61 = vrot.slane %v2617_v41, 3 }
 0x3f4   :  { %v3011_v49 = vpop.permute.xlu1 %1472  ;;  %v1589_v20 = vmul.f32 %v1565_v13, %v1415_v48 }
 0x3f5   :  { %v1475_v7 = vperm.slane %v3011_v49, 0  ;;  %v1567_v11 = vsel %vm1563_vm12, %v2617_v41, %v1554_v61 }
 0x3f6   :  { %v1591_v46 = vmul.f32 %v1567_v11, %v1427_v14  ;;  %v1557_v14 = vrot.slane %v2800_v25, 3 }
 0x3f7   :  { %v1487_v21 = vmul.f32 %v1475_v7, %v2822_v31  ;;  %v1533_v31 = vrot.slane %v1532_v4, 2 }
 0x3f8   :  { %v1513_v33 = vld [vmem:[#allocation1] sm:$0xff]  ;;  %v1570_v6 = vsel %vm1563_vm12, %v2800_v25, %v1557_v14  ;;  %v1560_v25 = vrot.slane %v2832_v53, 3 }
 0x3f9   :  { %1514 = vst [vmem:[#allocation1] ss:$9 sm:$0xff] %v1485_v0  ;;  %v1537_v2 = vsel %vm1522_vm13, %v1513_v33, 0.0  ;;  %v1534_v60 = vadd.f32 %v1533_v31, %v1532_v4  ;;  %v1568_v0 = vsel %vm1563_vm12, %v2797_v10, %v1555_v43  ;;  %v1594_v55 = vmul.f32 %v1570_v6, %v1445_v16  ;;  %v1718_v14 = vld [vmem:[#allocation10 + $0xc0] sm:$0xff]  ;;  %v1716_v6 = vld [vmem:[#allocation10 + $0xb0] sm:$0xff] }
 0x3fa   :  { %1515 = vst [vmem:[#allocation1 + $0x1] ss:$9 sm:$0xff] %v1486_v39  ;;  %v1538_v19 = vrot.slane %v1537_v2, 4  ;;  %v1569_v39 = vsel %vm1563_vm12, %v2790_v23, %v1556_v51  ;;  %v1592_v33 = vmul.f32 %v1568_v0, %v1433_v52  ;;  %v1559_v52 = vrot.slane %v2818_v26, 3 }
 0x3fb   :  { %1516 = vst [vmem:[#allocation1 + $0x2] ss:$9 sm:$0xff] %v1487_v21  ;;  %v1535_v30 = vrot.slane %v1534_v60, 1  ;;  %v1593_v41 = vmul.f32 %v1569_v39, %v1439_v63  ;;  %v1571_v63 = vsel %vm1563_vm12, %v2809_v29, %v1558_v24  ;;  %v1561_v29 = vrot.slane %v2848_v12, 3  ;;  %v1727_v39 = vld [vmem:[#allocation10 + $0x108] sm:$0xff]  ;;  %v1720_v24 = vld [vmem:[#allocation10 + $0xd0] sm:$0xff] }
 0x3fc   :  { %v1539_v22 = vadd.f32 %v1538_v19, %v1537_v2  ;;  %v1572_v56 = vsel %vm1563_vm12, %v2818_v26, %v1559_v52  ;;  %v1562_v16 = vrot.slane %v2858_v44, 3  ;;  %v1573_v26 = vsel %vm1563_vm12, %v2832_v53, %v1560_v25  ;;  %1746 = vmatpush.msra.mxu2 %v1727_v39  ;;  %v1715_v52 = vld [vmem:[#allocation10 + $0xa8] sm:$0xff] }
 0x3fd   :  { %v1536_v38 = vadd.f32 %v1535_v30, %v1534_v60  ;;  %v1596_v31 = vmul.f32 %v1572_v56, %v1457_v32  ;;  %v1597_v50 = vmul.f32 %v1573_v26, %v1463_v62  ;;  %v1574_v32 = vsel %vm1563_vm12, %v2848_v12, %v1561_v29  ;;  %v1714_v56 = vld [vmem:[#allocation10 + $0xa0] sm:$0xff]  ;;  %v1711_v25 = vld [vmem:[#allocation10 + $0x88] sm:$0xff]  ;;  %v1704_v26 = vld [vmem:[#allocation10 + $0x50] sm:$0xff] }
 0x3fe   :  { %v1540_v27 = vrot.slane %v1539_v22, 2  ;;  %v1575_v5 = vsel %vm1563_vm12, %v2858_v44, %v1562_v16  ;;  %v1706_v29 = vld [vmem:[#allocation10 + $0x60] sm:$0xff]  ;;  %v1708_v16 = vld [vmem:[#allocation10 + $0x70] sm:$0xff] }
 0x3ff   :  { %v1675_v45 = vsel %vm1044_vm4, %v1536_v38, %v1529_v54  ;;  %v1729_v54 = vld [vmem:[#allocation10 + $0x118] sm:$0xff] }
 0x400   :  { %v1541_v42 = vadd.f32 %v1540_v27, %v1539_v22  ;;  %v1595_v22 = vmul.f32 %v1571_v63, %v1451_v40  ;;  %v1598_v27 = vmul.f32 %v1574_v32, %v1469_v36  ;;  %1786 = vmatpush.msrb.mxu1 %v1729_v54  ;;  %v1717_v63 = vld [vmem:[#allocation10 + $0xb8] sm:$0xff] }
 0x401   :  { %v1701_v32 = vld [vmem:[#allocation10 + $0x38] sm:$0xff] }
 0x402   :  { %v1517_v28 = vld [vmem:[#allocation1] sm:$0xff]  ;;  %v1542_v48 = vrot.slane %v1541_v42, 1 }
 0x403   :  { %v1544_v37 = vsel %vm1522_vm13, %v1517_v28, 0.0  ;;  %1612 = vst [vmem:[#allocation1] ss:$9 sm:$0xff] %v2959_v47 }
 0x404   :  { %v1545_v34 = vrot.slane %v1544_v37, 4  ;;  %1614 = vst [vmem:[#allocation1 + $0x1] ss:$9 sm:$0xff] %v1589_v20  ;;  %v1543_v21 = vadd.f32 %v1542_v48, %v1541_v42  ;;  %v1599_v20 = vmul.f32 %v1575_v5, %v1475_v7  ;;  %v1663_v42 = vld [vmem:[#allocation5 + $0x2] sm:$0x3] }
 0x405   :  { %1616 = vst [vmem:[#allocation1 + $0x2] ss:$9 sm:$0xff] %v1590_v3  ;;  %v1662_v3 = vld [vmem:[#allocation5] sm:$0x3] }
 0x406   :  { %v1546_v15 = vadd.f32 %v1545_v34, %v1544_v37  ;;  %v1676_v10 = vsel %vm1047_vm5, %v1543_v21, %v1675_v45  ;;  %v1722_v45 = vld [vmem:[#allocation10 + $0xe0] sm:$0xff]  ;;  %v1697_v5 = vld [vmem:[#allocation10 + $0x18] sm:$0xff] }
 0x408   :  { %v1547_v59 = vrot.slane %v1546_v15, 2 }
 0x40a   :  { %v1548_v47 = vadd.f32 %v1547_v59, %v1546_v15 }
 0x40c   :  { %v1549_v2 = vrot.slane %v1548_v47, 1  ;;  %v1617_v4 = vld [vmem:[#allocation1] sm:$0xff] }
 0x40d   :  { %1618 = vst [vmem:[#allocation1] ss:$9 sm:$0xff] %v1591_v46  ;;  %v1634_v57 = vsel %vm1522_vm13, %v1617_v4, 0.0  ;;  %v1725_v4 = vld [vmem:[#allocation10 + $0xf8] sm:$0xff] }
 0x40e   :  { %v1550_v19 = vadd.f32 %v1549_v2, %v1548_v47  ;;  %1619 = vst [vmem:[#allocation1 + $0x1] ss:$9 sm:$0xff] %v1592_v33  ;;  %v1635_v17 = vrot.slane %v1634_v57, 4  ;;  %v1728_v33 = vld [vmem:[#allocation10 + $0x110] sm:$0xff] }
 0x40f   :  { %1620 = vst [vmem:[#allocation1 + $0x2] ss:$9 sm:$0xff] %v1593_v41  ;;  %1766 = vmatpush.msra.mxu3 %v1728_v33  ;;  %v1724_v2 = vld [vmem:[#allocation10 + $0xf0] sm:$0xff]  ;;  %v1726_v41 = vld [vmem:[#allocation10 + $0x100] sm:$0xff] }
 0x410   :  { %v1677_v23 = vsel %vm1050_vm7, %v1550_v19, %v1676_v10  ;;  %v1636_v28 = vadd.f32 %v1635_v17, %v1634_v57  ;;  %v1721_v19 = vld [vmem:[#allocation10 + $0xd8] sm:$0xff]  ;;  %1747 = vmatpush.msra.mxu2 %v1724_v2  ;;  %v1723_v10 = vld [vmem:[#allocation10 + $0xe8] sm:$0xff]  ;;  %1787 = vmatpush.msrb.mxu1 %v1726_v41 }
 0x411   :  { %1678 = vrot.lane.b32.xlu2 %v1677_v23, %s2266_s29  ;;  %1767 = vmatpush.msra.mxu3 %v1725_v4  ;;  %v1719_v23 = vld [vmem:[#allocation10 + $0xc8] sm:$0xff] }
 0x412   :  { %v1637_v36 = vrot.slane %v1636_v28, 2  ;;  %1748 = vmatpush.msra.mxu2 %v1721_v19  ;;  %1788 = vmatpush.msrb.mxu1 %v1723_v10  ;;  %v1703_v57 = vld [vmem:[#allocation10 + $0x48] sm:$0xff] }
 0x413   :  { %1768 = vmatpush.msra.mxu3 %v1722_v45  ;;  %v1699_v17 = vld [vmem:[#allocation10 + $0x28] sm:$0xff] }
 0x414   :  { %v1638_v7 = vadd.f32 %v1637_v36, %v1636_v28  ;;  %1749 = vmatpush.msra.mxu2 %v1718_v14  ;;  %1789 = vmatpush.msrb.mxu1 %v1720_v24  ;;  %v1730_v36 = vld [vmem:[%s3110_s6] sm:$0x7]  ;;  %s2280_s6 = smov [#allocation11]  }
 0x415   :  { %1769 = vmatpush.msra.mxu3 %v1719_v23  ;;  %s1867_s11 = sshll.u32 %s2280_s6, 4  ;;  %s1868_s11 = int_to_ptr.vmem [resolvable:$true] %s1867_s11 }
 0x416   :  { %v1621_v1 = vld [vmem:[#allocation1] sm:$0xff]  ;;  %v1639_v43 = vrot.slane %v1638_v7, 1  ;;  %1750 = vmatpush.msra.mxu2 %v1715_v52  ;;  %1790 = vmatpush.msrb.mxu1 %v1717_v63 }
 0x417   :  { %1622 = vst [vmem:[#allocation1] ss:$9 sm:$0xff] %v1594_v55  ;;  %v1641_v18 = vsel %vm1522_vm13, %v1621_v1, 0.0  ;;  %v1712_v55 = vld [vmem:[#allocation10 + $0x90] sm:$0xff]  ;;  %1770 = vmatpush.msra.mxu3 %v1716_v6  ;;  %v1709_v1 = vld [vmem:[#allocation10 + $0x78] sm:$0xff] }
 0x418   :  { %1623 = vst [vmem:[#allocation1 + $0x1] ss:$9 sm:$0xff] %v1595_v22  ;;  %v1642_v40 = vrot.slane %v1641_v18, 4  ;;  %v1640_v11 = vadd.f32 %v1639_v43, %v1638_v7  ;;  %v1713_v22 = vld [vmem:[#allocation10 + $0x98] sm:$0xff]  ;;  %1751 = vmatpush.msra.mxu2 %v1712_v55  ;;  %1791 = vmatpush.msrb.mxu1 %v1714_v56 }
 0x419   :  { %1624 = vst [vmem:[#allocation1 + $0x2] ss:$9 sm:$0xff] %v1596_v31  ;;  %v1710_v31 = vld [vmem:[#allocation10 + $0x80] sm:$0xff]  ;;  %1771 = vmatpush.msra.mxu3 %v1713_v22 }
 0x41a   :  { %v1643_v35 = vadd.f32 %v1642_v40, %v1641_v18  ;;  %v1707_v18 = vld [vmem:[#allocation10 + $0x68] sm:$0xff]  ;;  %1752 = vmatpush.msra.mxu2 %v1709_v1  ;;  %1792 = vmatpush.msrb.mxu1 %v1711_v25  ;;  %v1705_v40 = vld [vmem:[#allocation10 + $0x58] sm:$0xff] }
 0x41b   :  { %1772 = vmatpush.msra.mxu3 %v1710_v31 }
 0x41c   :  { %v1644_v60 = vrot.slane %v1643_v35, 2  ;;  %1753 = vmatpush.msra.mxu2 %v1706_v29  ;;  %1793 = vmatpush.msrb.mxu1 %v1708_v16 }
 0x41d   :  { %1773 = vmatpush.msra.mxu3 %v1707_v18 }
 0x41e   :  { %v1645_v37 = vadd.f32 %v1644_v60, %v1643_v35  ;;  %1754 = vmatpush.msra.mxu2 %v1703_v57  ;;  %1794 = vmatpush.msrb.mxu1 %v1705_v40  ;;  %v1696_v35 = vld [vmem:[#allocation10 + $0x10] sm:$0xff] }
 0x41f   :  { %1774 = vmatpush.msra.mxu3 %v1704_v26 }
 0x420   :  { %v1625_v13 = vld [vmem:[#allocation1] sm:$0xff]  ;;  %v1646_v61 = vrot.slane %v1645_v37, 1 }
 0x421   :  { %1626 = vst [vmem:[#allocation1] ss:$9 sm:$0xff] %v1597_v50  ;;  %v1648_v53 = vsel %vm1522_vm13, %v1625_v13, 0.0  ;;  %v1700_v50 = vld [vmem:[#allocation10 + $0x30] sm:$0xff]  ;;  %v1698_v13 = vld [vmem:[#allocation10 + $0x20] sm:$0xff]  ;;  %1775 = vmatpush.msra.mxu3 %v1701_v32 }
 0x422   :  { %1627 = vst [vmem:[#allocation1 + $0x1] ss:$9 sm:$0xff] %v1598_v27  ;;  %v1649_v62 = vrot.slane %v1648_v53, 4  ;;  %v1647_v51 = vadd.f32 %v1646_v61, %v1645_v37  ;;  %v1702_v27 = vld [vmem:[#allocation10 + $0x40] sm:$0xff]  ;;  %1755 = vmatpush.msra.mxu2 %v1700_v50  ;;  %v1732_v37 = vperm.slane %v1730_v36, 0 }
 0x423   :  { %1628 = vst [vmem:[#allocation1 + $0x2] ss:$9 sm:$0xff] %v1599_v20  ;;  %1795 = vmatpush.msrb.mxu1 %v1702_v27  ;;  %1776 = vmatpush.msra.mxu3 %v1698_v13  ;;  %v1694_v20 = vld [vmem:[#allocation10] sm:$0xff] }
 0x424   :  { %v1650_v12 = vadd.f32 %v1649_v62, %v1648_v53  ;;  %v1685_v46 = vsel %vm1044_vm4, %v1647_v51, %v1640_v11  ;;  %1756 = vmatpush.msra.mxu2 %v1697_v5  ;;  %v1695_v53 = vld [vmem:[#allocation10 + $0x8] sm:$0xff]  ;;  %vm1692_vm4 = vcmask 523264  }
 0x425   :  { %1796 = vmatpush.msrb.mxu1 %v1699_v17  ;;  %1777 = vmatpush.msra.mxu3 %v1695_v53 }
 0x426   :  { %v1651_v58 = vrot.slane %v1650_v12, 2  ;;  %1757 = vmatpush.msra.mxu2 %v1694_v20 }
 0x427   :  { %1797 = vmatpush.msrb.mxu1 %v1696_v35 }
 0x428   :  { %v1652_v9 = vadd.f32 %v1651_v58, %v1650_v12 }
 0x42a   :  { %v1629_v44 = vld [vmem:[#allocation1] sm:$0xff]  ;;  %v1653_v15 = vrot.slane %v1652_v9, 1 }
 0x42b   :  { %v1655_v49 = vsel %vm1522_vm13, %v1629_v44, 0.0  ;;  %1666 = vst [vmem:[#allocation1] ss:$4 sm:$0xff] %v1662_v3  ;;  %v1734_v3 = vperm.slane %v1730_v36, 2 }
 0x42c   :  { %v1656_v34 = vrot.slane %v1655_v49, 4  ;;  %1668 = vst [vmem:[#allocation1 + $0x1] ss:$4 sm:$0xff] %v1663_v42  ;;  %v1654_v59 = vadd.f32 %v1653_v15, %v1652_v9  ;;  %v1733_v9 = vperm.slane %v1730_v36, 1 }
 0x42e   :  { %v1657_v30 = vadd.f32 %v1656_v34, %v1655_v49  ;;  %v1686_v0 = vsel %vm1047_vm5, %v1654_v59, %v1685_v46  ;;  %vm1738_vm5 = vcmask 785408  }
 0x430   :  { %v1658_v48 = vrot.slane %v1657_v30, 2 }
 0x432   :  { %v1659_v8 = vadd.f32 %v1658_v48, %v1657_v30 }
 0x433   :  { %v1669_v28 = vld.sshfl [vmem:[#allocation1] sm:$0xff pattern:$0x73625140] }
 0x434   :  { %v1660_v38 = vrot.slane %v1659_v8, 1 }
 0x436   :  { %v1661_v47 = vadd.f32 %v1660_v38, %v1659_v8 }
 0x438   :  { %v1687_v21 = vsel %vm1050_vm7, %v1661_v47, %v1686_v0  ;;  %vm1814_vm7 = vcmask 1041408  }
 0x439   :  { %1688 = vrot.lane.b32.xlu0 %v1687_v21, %s2279_s4 }
 0x46b   :  { %v1679_v62 = vpop.permute.xlu2 %1678 }
 0x46c   :  { %v1691_v12 = vsel %vm115_vm0, %v1669_v28, %v1679_v62  ;;  %vm1832_vm0 = vcmask 1043458  }
 0x4ab   :  { %v1689_v60 = vpop.permute.xlu0 %1688 }
 0x4ac   :  { %v1693_v58 = vsel %vm1692_vm4, %v1691_v12, %v1689_v60 }
 0x4ad   :  { %1950 = vmatmul.msk.f32.vlgmr.msra.gmra.mxu2 %vm1738_vm5, %v1693_v58  ;;  %1951 = vmatmul.msk.f32.vlgmr.msra.gmra.mxu3 %vm1738_vm5, %v1693_v58 }
 0x4ae   :  { %1952 = vmatmul.msk.f32.vlgmr.msrb.gmra.mxu1 %vm1738_vm5, %v1693_v58 }
 0x52b   :  { %v1799_v42 = vpop.f32.mrf.mxu1 }
 0x52c   :  { %v1800_v44 = vadd.f32 %v1799_v42, %v1734_v3 }
 0x52e   :  { %v1807_v49 = vrot.slane %v1800_v44, 2  ;;  %v1824_v15 = vmul.f32 %v1800_v44, %v1800_v44 }
 0x530   :  { %v1759_v7 = vpop.f32.mrf.mxu2  ;;  %v1779_v34 = vpop.f32.mrf.mxu3  ;;  %v1813_v59 = vmul.f32 %v1807_v49, %v1800_v44  ;;  %v1836_v33 = vsel %vm1832_vm0, %v1824_v15, 0.0  ;;  %v1828_v19 = vsel %vm1814_vm7, %v1824_v15, 0.0 }
 0x531   :  { %v1760_v61 = vadd.f32 %v1759_v7, %v1732_v37  ;;  %v1780_v30 = vadd.f32 %v1779_v34, %v1733_v9 }
 0x532   :  { %v1818_v14 = vsel %vm1814_vm7, %v1813_v59, 0.0 }
 0x533   :  { %v1805_v43 = vrot.slane %v1760_v61, 2  ;;  %v1822_v48 = vmul.f32 %v1760_v61, %v1760_v61  ;;  %v1806_v51 = vrot.slane %v1780_v30, 2  ;;  %v1823_v8 = vmul.f32 %v1780_v30, %v1780_v30 }
 0x535   :  { %v1811_v11 = vmul.f32 %v1805_v43, %v1760_v61  ;;  %v1812_v38 = vmul.f32 %v1806_v51, %v1780_v30  ;;  %v1833_v47 = vsel %vm1832_vm0, %v1822_v48, 0.0  ;;  %v1834_v46 = vsel %vm1832_vm0, %v1823_v8, 0.0 }
 0x536   :  { %v1835_v0 = vadd.f32 %v1834_v46, %v1833_v47  ;;  %v1825_v21 = vsel %vm1814_vm7, %v1822_v48, 0.0  ;;  %v1826_v39 = vsel %vm1814_vm7, %v1823_v8, 0.0 }
 0x537   :  { %v1827_v54 = vadd.f32 %v1826_v39, %v1825_v21  ;;  %v1815_v2 = vsel %vm1814_vm7, %v1811_v11, 0.0  ;;  %v1816_v4 = vsel %vm1814_vm7, %v1812_v38, 0.0 }
 0x538   :  { %v1837_v41 = vadd.f32 %v1836_v33, %v1835_v0  ;;  %v1817_v45 = vadd.f32 %v1816_v4, %v1815_v2 }
 0x539   :  { %v1829_v10 = vadd.f32 %v1828_v19, %v1827_v54 }
 0x53a   :  { %1838 = vadd.xlane.f32.xlu1 %v1837_v41  ;;  %v1819_v23 = vadd.f32 %v1818_v14, %v1817_v45 }
 0x53b   :  { %1830 = vadd.xlane.f32.xlu2 %v1829_v10 }
 0x53c   :  { %1820 = vadd.xlane.f32.xlu0 %v1819_v23 }
 0x5ad   :  { %v1839_v24 = vpop.xlane.xlu1 %1838 }
 0x5ae   :  { %v1841_v52 = vrot.slane %v1839_v24, 2  ;;  %v1831_v6 = vpop.xlane.xlu2 %1830 }
 0x5af   :  { %v1821_v16 = vpop.xlane.xlu0 %1820 }
 0x5b0   :  { %v1843_v63 = vmul.f32 %v1841_v52, %v1831_v6 }
 0x5b2   :  { %v1844_v55 = vmax.f32 %v1843_v63, 1e-16 }
 0x5b4   :  { %2111 = vrsqrt.f32 %v1844_v55  ;;  %vm1851_vm15 = vweird.f32 %v1844_v55 }
 0x5ba   :  { %v2112_v22 = vpop.eup %2111 }
 0x5bb   :  { %v1846_v56 = vmul.f32 %v2112_v22, %v1844_v55  ;;  %vm1852_vm14 = vweird.f32 %v2112_v22 }
 0x5bc   :  { %vm1853_vm2 = vmor %vm1851_vm15, %vm1852_vm14 }
 0x5bd   :  { %v1847_v1 = vmul.f32 %v2112_v22, %v1846_v56 }
 0x5bf   :  { %v1848_v31 = vmul.f32 0.5, %v1847_v1 }
 0x5c1   :  { %v1849_v25 = vsub.f32 1.5, %v1848_v31 }
 0x5c3   :  { %v1850_v29 = vmul.f32 %v2112_v22, %v1849_v25 }
 0x5c5   :  { %v1854_v18 = vsel %vm1853_vm2, %v2112_v22, %v1850_v29 }
 0x5c6   :  { %v1855_v57 = vmul.f32 %v1854_v18, %v1821_v16 }
 0x5c8   :  { %1858 = vperm.xlu1 %1973, %v1855_v57  }
 0x63a   :  { %v1859_v26 = vpop.permute.xlu1 %1858 }
 0x63b   :  { %1861 = vst [vmem:[#allocation11] sm:$0x3] %v1859_v26 }
 0x63c   :  { %1872 = dma.vmem_to_hbm [thread:$0]  %s1868_s11, 32, %s1870_s14, [#allocation4]  }
 0x63d   :  { %2263 = dma.done.wait [#allocation4], 32  }
 0x63e   :  { %2264 = vsyncadd [#allocation4], 4294967264 }
 0x63f   :  { %1877 = vsyncpa [#allocation3], 1 }
 0x640   :  { %1878 = vsyncpa [#allocation6], 1 }
 0x641   :  { %1879 = vsyncpa [#allocation9], 1 }
 0x642   :  { %1880 = vsyncpa [#allocation4], 1 }

</bundles_post_ra>
